<compile_context>
chip_gen: v7x
topology: tpu7x:2x2x1
jax: 0.10.0
libtpu: 0.0.40
codegen_flags: <defaults>
</compile_context>

<pallas_src>
import jax
import jax.numpy as jnp
from jax import lax
from jax.experimental import pallas as pl
from jax.experimental.pallas import tpu as pltpu

# TODO(synk): verify 0.02 against the SCorP ImNet config (PyTorch nn.LeakyReLU default is 0.01).
LEAKY_SLOPE = 0.02


# -----------------------------------------------------------------------------
# Fused kernel: one grid step == one image
# -----------------------------------------------------------------------------
def _scorp_fused_kernel(p_ref, m_ref, w1_ref, b1_ref, w2_ref, b2_ref,
                        wf_ref, bf_ref, t_ref, iw1a_ref, iw1b_ref, ib1_ref,
                        iw2_ref, ib2_ref, iw3_ref, ib3_ref, o_ref):
    n_tap, R, _ = p_ref.shape           # (9, Ho*Wo, 9)
    C2 = w2_ref.shape[2]

    w1 = w1_ref[...]                    # (9, C1)  conv1 weight (im2col layout)
    b1 = b1_ref[...]                    # (1, C1)

    # ---- fused conv1 + conv2 (all MXU GEMMs, intermediates stay in vregs) ----
    acc = jnp.zeros((R, C2), jnp.float32)
    for t in range(n_tap):
        h1 = jnp.dot(p_ref[t], w1, preferred_element_type=jnp.float32) + b1
        h1 = jnp.maximum(h1, 0.0) * m_ref[t]          # mask == conv2 zero padding
        acc = acc + jnp.dot(h1, w2_ref[t], preferred_element_type=jnp.float32)
    feat = jnp.maximum(acc + b2_ref[...], 0.0)        # (R, C2) conv2 output

    # ---- global average pool + FC -> latent z --------------------------------
    g = jnp.mean(feat, axis=0, keepdims=True)         # (1, C2)
    g = jnp.broadcast_to(g, (8, C2))                  # keep matmul rows >= 8
    z = jnp.dot(g, wf_ref[...], preferred_element_type=jnp.float32) + bf_ref[...]

    # ---- fused ImNet ----------------------------------------------------------
    # layer1([pt ; z]) = pt @ W1[:3] + z @ W1[3:] + b1 ; z-part computed once.
    zp = jnp.dot(z, iw1b_ref[...], preferred_element_type=jnp.float32)[0:1, :]
    tpl = t_ref[...]                                   # (M, 3)
    h = jnp.dot(tpl, iw1a_ref[...], preferred_element_type=jnp.float32) + zp + ib1_ref[...]
    h = jnp.where(h > 0, h, LEAKY_SLOPE * h)
    h = jnp.dot(h, iw2_ref[...], preferred_element_type=jnp.float32) + ib2_ref[...]
    h = jnp.where(h > 0, h, LEAKY_SLOPE * h)
    d = jnp.dot(h, iw3_ref[...], preferred_element_type=jnp.float32) + ib3_ref[...]
    o_ref[...] = (d + tpl).astype(o_ref.dtype)         # correspondences


# -----------------------------------------------------------------------------
# Host-side prep: per-(conv2-tap) im2col of the raw image + conv2 pad mask
# -----------------------------------------------------------------------------
def _conv_tap_patches(images):
    """For conv1 (3x3/s1/p1) followed by conv2 (3x3/s2/p1) on single-channel images."""
    B, C, H, W = images.shape
    assert C == 1, "stand-in ConvolutionalBackbone takes single-channel images"
    Ho, Wo = H // 2, W // 2
    R = Ho * Wo
    img_p = jnp.pad(images[:, 0], ((0, 0), (2, 2), (2, 2)))   # pad 2 covers both convs' padding

    t = jnp.arange(9)
    ky2, kx2 = t // 3, t % 3          # conv2 tap
    ky1, kx1 = t // 3, t % 3          # conv1 tap
    r = jnp.arange(R)
    yo, xo = r // Wo, r % Wo
    # image pixel (in pad-2 coords) feeding conv1-output position
    # (2*yo+ky2-1, 2*xo+kx2-1) at conv1 tap (ky1, kx1):
    row = 2 * yo[None, :, None] + ky2[:, None, None] + ky1[None, None, :]   # (9, R, 9)
    col = 2 * xo[None, :, None] + kx2[:, None, None] + kx1[None, None, :]
    patches = img_p[:, row, col]                                            # (B, 9, R, 9)

    yh = 2 * yo[None, :] + ky2[:, None] - 1
    xh = 2 * xo[None, :] + kx2[:, None] - 1
    valid = (yh >= 0) & (yh < H) & (xh >= 0) & (xh < W)
    mask = valid.astype(images.dtype)[:, :, None]                           # (9, R, 1)
    return patches, mask


# -----------------------------------------------------------------------------
# SCorP.forward (image branch): z = encoder(images); imnet(z, template)
# -----------------------------------------------------------------------------
def scorp_forward(images, template, enc_params, imnet_params):
    (w1, b1), (w2, b2), (wf, bf) = enc_params
    iw1, ib1, iw2, ib2, iw3, ib3 = imnet_params

    B, _, H, W = images.shape
    R = (H // 2) * (W // 2)
    C1 = w1.shape[0]
    C2 = w2.shape[0]
    E = wf.shape[1]
    M = template.shape[0]
    nf = iw1.shape[1]

    patches, mask = _conv_tap_patches(images)
    w1m = w1.reshape(C1, 9).T                                    # (9, C1), tap = ky*3+kx
    w2s = jnp.transpose(w2, (2, 3, 1, 0)).reshape(9, C1, C2)     # (9, C1, C2) per conv2 tap

    rep2 = lambda i: (0, 0)
    rep3 = lambda i: (0, 0, 0)

    out = pl.pallas_call(
        _scorp_fused_kernel,
        out_shape=jax.ShapeDtypeStruct((B, M, 3), jnp.float32),
        grid_spec=pltpu.PrefetchScalarGridSpec(
            num_scalar_prefetch=0,
            grid=(B,),
            in_specs=[
                pl.BlockSpec((None, 9, R, 9), lambda i: (i, 0, 0, 0)),   # per-tap im2col
                pl.BlockSpec((9, R, 1), rep3),                           # conv2 pad mask
                pl.BlockSpec((9, C1), rep2),                             # conv1 weight
                pl.BlockSpec((1, C1), rep2),                             # conv1 bias
                pl.BlockSpec((9, C1, C2), rep3),                         # conv2 weight per tap
                pl.BlockSpec((1, C2), rep2),                             # conv2 bias
                pl.BlockSpec((C2, E), rep2),                             # fc weight
                pl.BlockSpec((1, E), rep2),                              # fc bias
                pl.BlockSpec((M, 3), rep2),                              # template
                pl.BlockSpec((3, nf), rep2),                             # imnet W1 (point part)
                pl.BlockSpec((E, nf), rep2),                             # imnet W1 (latent part)
                pl.BlockSpec((1, nf), rep2),                             # imnet b1
                pl.BlockSpec((nf, nf), rep2),                            # imnet W2
                pl.BlockSpec((1, nf), rep2),                             # imnet b2
                pl.BlockSpec((nf, 3), rep2),                             # imnet W3
                pl.BlockSpec((1, 3), rep2),                              # imnet b3
            ],
            out_specs=pl.BlockSpec((None, M, 3), lambda i: (i, 0, 0)),
        ),
        compiler_params=pltpu.CompilerParams(
            dimension_semantics=("parallel",)),
    )(patches, mask, w1m, b1.reshape(1, C1), w2s, b2.reshape(1, C2),
      wf, bf.reshape(1, E), template,
      iw1[:3], iw1[3:], ib1.reshape(1, nf), iw2, ib2.reshape(1, nf),
      iw3, ib3.reshape(1, 3))
    return out


# -----------------------------------------------------------------------------
# Pure-JAX reference (for correctness) + params
# -----------------------------------------------------------------------------
def _reference_forward(images, template, enc_params, imnet_params):
    (w1, b1), (w2, b2), (wf, bf) = enc_params
    iw1, ib1, iw2, ib2, iw3, ib3 = imnet_params
    dn = ("NCHW", "OIHW", "NCHW")
    h = lax.conv_general_dilated(images, w1, (1, 1), ((1, 1), (1, 1)),
                                 dimension_numbers=dn)
    h = jnp.maximum(h + b1[None, :, None, None], 0.0)
    h = lax.conv_general_dilated(h, w2, (2, 2), ((1, 1), (1, 1)),
                                 dimension_numbers=dn)
    h = jnp.maximum(h + b2[None, :, None, None], 0.0)
    g = jnp.mean(h, axis=(2, 3))
    z = g @ wf + bf
    B, M = images.shape[0], template.shape[0]
    x = jnp.concatenate(
        [jnp.broadcast_to(template[None], (B, M, 3)),
         jnp.broadcast_to(z[:, None, :], (B, M, z.shape[1]))], axis=-1)
    h = x @ iw1 + ib1
    h = jnp.where(h > 0, h, LEAKY_SLOPE * h)
    h = h @ iw2 + ib2
    h = jnp.where(h > 0, h, LEAKY_SLOPE * h)
    d = h @ iw3 + ib3
    return d + template[None]


def init_params(key, emb_dims=32, nf=16):
    ks = jax.random.split(key, 12)
    s = 0.1
    enc = (
        (s * jax.random.normal(ks[0], (8, 1, 3, 3), jnp.float32),
         s * jax.random.normal(ks[1], (8,), jnp.float32)),
        (s * jax.random.normal(ks[2], (16, 8, 3, 3), jnp.float32),
         s * jax.random.normal(ks[3], (16,), jnp.float32)),
        (s * jax.random.normal(ks[4], (16, emb_dims), jnp.float32),
         s * jax.random.normal(ks[5], (emb_dims,), jnp.float32)),
    )
    imnet = (
        s * jax.random.normal(ks[6], (3 + emb_dims, nf), jnp.float32),
        s * jax.random.normal(ks[7], (nf,), jnp.float32),
        s * jax.random.normal(ks[8], (nf, nf), jnp.float32),
        s * jax.random.normal(ks[9], (nf,), jnp.float32),
        s * jax.random.normal(ks[10], (nf, 3), jnp.float32),
        s * jax.random.normal(ks[11], (3,), jnp.float32),
    )
    return enc, imnet


if __name__ == "__main__":
    key = jax.random.PRNGKey(0)
    k_img, k_tmpl, k_par = jax.random.split(key, 3)

    B, C, H, W = 2, 1, 16, 16        # images (NCHW)
    emb_dims, nf, M = 32, 16, 64     # latent dim, ImNet width, template points

    images = jax.random.normal(k_img, (B, C, H, W), jnp.float32)
    template = jax.random.normal(k_tmpl, (M, 3), jnp.float32)   # args.input_x_T
    enc_params, imnet_params = init_params(k_par, emb_dims, nf)

    fwd = jax.jit(scorp_forward)
    correspondences = fwd(images, template, enc_params, imnet_params)
    jax.block_until_ready(correspondences)

    ref = _reference_forward(images, template, enc_params, imnet_params)
    assert correspondences.shape == (B, M, 3)
    assert bool(jnp.all(jnp.isfinite(correspondences)))
    assert bool(jnp.allclose(correspondences, ref, rtol=2e-3, atol=2e-3)), \
        float(jnp.max(jnp.abs(correspondences - ref)))
    print("KERNEL_OK")
</pallas_src>

<mosaic_0001>
module attributes {stable_mosaic.version = 11 : i64} {
  func.func @_scorp_fused_kernel(%arg0: i32, %arg1: memref<1x9x64x9xf32, #tpu.memory_space<vmem>>, %arg2: memref<9x64x1xf32, #tpu.memory_space<vmem>>, %arg3: memref<9x8xf32, #tpu.memory_space<vmem>>, %arg4: memref<1x8xf32, #tpu.memory_space<vmem>>, %arg5: memref<9x8x16xf32, #tpu.memory_space<vmem>>, %arg6: memref<1x16xf32, #tpu.memory_space<vmem>>, %arg7: memref<16x32xf32, #tpu.memory_space<vmem>>, %arg8: memref<1x32xf32, #tpu.memory_space<vmem>>, %arg9: memref<64x3xf32, #tpu.memory_space<vmem>>, %arg10: memref<3x16xf32, #tpu.memory_space<vmem>>, %arg11: memref<32x16xf32, #tpu.memory_space<vmem>>, %arg12: memref<1x16xf32, #tpu.memory_space<vmem>>, %arg13: memref<16x16xf32, #tpu.memory_space<vmem>>, %arg14: memref<1x16xf32, #tpu.memory_space<vmem>>, %arg15: memref<16x3xf32, #tpu.memory_space<vmem>>, %arg16: memref<1x3xf32, #tpu.memory_space<vmem>>, %arg17: memref<1x64x3xf32, #tpu.memory_space<vmem>>) attributes {dimension_semantics = [#tpu.dimension_semantics<parallel>], iteration_bounds = array<i64: 2>, scalar_prefetch = 0 : i64, scratch_operands = 0 : i64, tpu.core_type = #tpu.core_type<tc>, window_params = [{transform_indices = @transform_0, window_bounds = array<i64: 1, 9, 64, 9>}, {pipeline_mode = #tpu.pipeline_mode<synchronous>, transform_indices = @transform_1, window_bounds = array<i64: 9, 64, 1>}, {pipeline_mode = #tpu.pipeline_mode<synchronous>, transform_indices = @transform_2, window_bounds = array<i64: 9, 8>}, {pipeline_mode = #tpu.pipeline_mode<synchronous>, transform_indices = @transform_3, window_bounds = array<i64: 1, 8>}, {pipeline_mode = #tpu.pipeline_mode<synchronous>, transform_indices = @transform_4, window_bounds = array<i64: 9, 8, 16>}, {pipeline_mode = #tpu.pipeline_mode<synchronous>, transform_indices = @transform_5, window_bounds = array<i64: 1, 16>}, {pipeline_mode = #tpu.pipeline_mode<synchronous>, transform_indices = @transform_6, window_bounds = array<i64: 16, 32>}, {pipeline_mode = #tpu.pipeline_mode<synchronous>, transform_indices = @transform_7, window_bounds = array<i64: 1, 32>}, {pipeline_mode = #tpu.pipeline_mode<synchronous>, transform_indices = @transform_8, window_bounds = array<i64: 64, 3>}, {pipeline_mode = #tpu.pipeline_mode<synchronous>, transform_indices = @transform_9, window_bounds = array<i64: 3, 16>}, {pipeline_mode = #tpu.pipeline_mode<synchronous>, transform_indices = @transform_10, window_bounds = array<i64: 32, 16>}, {pipeline_mode = #tpu.pipeline_mode<synchronous>, transform_indices = @transform_11, window_bounds = array<i64: 1, 16>}, {pipeline_mode = #tpu.pipeline_mode<synchronous>, transform_indices = @transform_12, window_bounds = array<i64: 16, 16>}, {pipeline_mode = #tpu.pipeline_mode<synchronous>, transform_indices = @transform_13, window_bounds = array<i64: 1, 16>}, {pipeline_mode = #tpu.pipeline_mode<synchronous>, transform_indices = @transform_14, window_bounds = array<i64: 16, 3>}, {pipeline_mode = #tpu.pipeline_mode<synchronous>, transform_indices = @transform_15, window_bounds = array<i64: 1, 3>}, {transform_indices = @transform_16, window_bounds = array<i64: 1, 64, 3>}]} {
    %c0 = arith.constant 0 : index
    %c0_0 = arith.constant 0 : index
    %0 = vector.load %arg3[%c0, %c0_0] : memref<9x8xf32, #tpu.memory_space<vmem>>, vector<9x8xf32>
    %c0_1 = arith.constant 0 : index
    %c0_2 = arith.constant 0 : index
    %1 = vector.load %arg4[%c0_1, %c0_2] : memref<1x8xf32, #tpu.memory_space<vmem>>, vector<1x8xf32>
    %cst = arith.constant 0.000000e+00 : f32
    %2 = vector.broadcast %cst : f32 to vector<64x16xf32>
    %c0_3 = arith.constant 0 : index
    %c0_4 = arith.constant 0 : index
    %c0_5 = arith.constant 0 : index
    %c0_6 = arith.constant 0 : index
    %3 = vector.load %arg1[%c0_3, %c0_4, %c0_5, %c0_6] : memref<1x9x64x9xf32, #tpu.memory_space<vmem>>, vector<1x1x64x9xf32>
    %4 = vector.shape_cast %3 : vector<1x1x64x9xf32> to vector<64x9xf32>
    %cst_7 = arith.constant dense<0.000000e+00> : vector<64x8xf32>
    %5 = tpu.matmul %4, %0, %cst_7 {dimension_numbers = #tpu.dot_dimension_numbers<[1], [0], [0], [1], [0, 0, 1, 1], [], []>} : vector<64x9xf32>, vector<9x8xf32>, vector<64x8xf32> -> vector<64x8xf32>
    %6 = vector.broadcast %1 : vector<1x8xf32> to vector<64x8xf32>
    %7 = arith.addf %5, %6 : vector<64x8xf32>
    %cst_8 = arith.constant 0.000000e+00 : f32
    %8 = vector.broadcast %cst_8 : f32 to vector<64x8xf32>
    %9 = arith.maximumf %7, %8 : vector<64x8xf32>
    %c0_9 = arith.constant 0 : index
    %c0_10 = arith.constant 0 : index
    %c0_11 = arith.constant 0 : index
    %10 = vector.load %arg2[%c0_9, %c0_10, %c0_11] : memref<9x64x1xf32, #tpu.memory_space<vmem>>, vector<1x64x1xf32>
    %11 = vector.shape_cast %10 : vector<1x64x1xf32> to vector<64x1xf32>
    %12 = vector.broadcast %11 : vector<64x1xf32> to vector<64x8xf32>
    %13 = arith.mulf %9, %12 : vector<64x8xf32>
    %c0_12 = arith.constant 0 : index
    %c0_13 = arith.constant 0 : index
    %c0_14 = arith.constant 0 : index
    %14 = vector.load %arg5[%c0_12, %c0_13, %c0_14] : memref<9x8x16xf32, #tpu.memory_space<vmem>>, vector<1x8x16xf32>
    %15 = vector.shape_cast %14 : vector<1x8x16xf32> to vector<8x16xf32>
    %cst_15 = arith.constant dense<0.000000e+00> : vector<64x16xf32>
    %16 = tpu.matmul %13, %15, %cst_15 {dimension_numbers = #tpu.dot_dimension_numbers<[1], [0], [0], [1], [0, 0, 1, 1], [], []>} : vector<64x8xf32>, vector<8x16xf32>, vector<64x16xf32> -> vector<64x16xf32>
    %17 = arith.addf %2, %16 : vector<64x16xf32>
    %c0_16 = arith.constant 0 : index
    %c1 = arith.constant 1 : index
    %c0_17 = arith.constant 0 : index
    %c0_18 = arith.constant 0 : index
    %18 = vector.load %arg1[%c0_16, %c1, %c0_17, %c0_18] : memref<1x9x64x9xf32, #tpu.memory_space<vmem>>, vector<1x1x64x9xf32>
    %19 = vector.shape_cast %18 : vector<1x1x64x9xf32> to vector<64x9xf32>
    %cst_19 = arith.constant dense<0.000000e+00> : vector<64x8xf32>
    %20 = tpu.matmul %19, %0, %cst_19 {dimension_numbers = #tpu.dot_dimension_numbers<[1], [0], [0], [1], [0, 0, 1, 1], [], []>} : vector<64x9xf32>, vector<9x8xf32>, vector<64x8xf32> -> vector<64x8xf32>
    %21 = vector.broadcast %1 : vector<1x8xf32> to vector<64x8xf32>
    %22 = arith.addf %20, %21 : vector<64x8xf32>
    %cst_20 = arith.constant 0.000000e+00 : f32
    %23 = vector.broadcast %cst_20 : f32 to vector<64x8xf32>
    %24 = arith.maximumf %22, %23 : vector<64x8xf32>
    %c1_21 = arith.constant 1 : index
    %c0_22 = arith.constant 0 : index
    %c0_23 = arith.constant 0 : index
    %25 = vector.load %arg2[%c1_21, %c0_22, %c0_23] : memref<9x64x1xf32, #tpu.memory_space<vmem>>, vector<1x64x1xf32>
    %26 = vector.shape_cast %25 : vector<1x64x1xf32> to vector<64x1xf32>
    %27 = vector.broadcast %26 : vector<64x1xf32> to vector<64x8xf32>
    %28 = arith.mulf %24, %27 : vector<64x8xf32>
    %c1_24 = arith.constant 1 : index
    %c0_25 = arith.constant 0 : index
    %c0_26 = arith.constant 0 : index
    %29 = vector.load %arg5[%c1_24, %c0_25, %c0_26] : memref<9x8x16xf32, #tpu.memory_space<vmem>>, vector<1x8x16xf32>
    %30 = vector.shape_cast %29 : vector<1x8x16xf32> to vector<8x16xf32>
    %cst_27 = arith.constant dense<0.000000e+00> : vector<64x16xf32>
    %31 = tpu.matmul %28, %30, %cst_27 {dimension_numbers = #tpu.dot_dimension_numbers<[1], [0], [0], [1], [0, 0, 1, 1], [], []>} : vector<64x8xf32>, vector<8x16xf32>, vector<64x16xf32> -> vector<64x16xf32>
    %32 = arith.addf %17, %31 : vector<64x16xf32>
    %c0_28 = arith.constant 0 : index
    %c2 = arith.constant 2 : index
    %c0_29 = arith.constant 0 : index
    %c0_30 = arith.constant 0 : index
    %33 = vector.load %arg1[%c0_28, %c2, %c0_29, %c0_30] : memref<1x9x64x9xf32, #tpu.memory_space<vmem>>, vector<1x1x64x9xf32>
    %34 = vector.shape_cast %33 : vector<1x1x64x9xf32> to vector<64x9xf32>
    %cst_31 = arith.constant dense<0.000000e+00> : vector<64x8xf32>
    %35 = tpu.matmul %34, %0, %cst_31 {dimension_numbers = #tpu.dot_dimension_numbers<[1], [0], [0], [1], [0, 0, 1, 1], [], []>} : vector<64x9xf32>, vector<9x8xf32>, vector<64x8xf32> -> vector<64x8xf32>
    %36 = vector.broadcast %1 : vector<1x8xf32> to vector<64x8xf32>
    %37 = arith.addf %35, %36 : vector<64x8xf32>
    %cst_32 = arith.constant 0.000000e+00 : f32
    %38 = vector.broadcast %cst_32 : f32 to vector<64x8xf32>
    %39 = arith.maximumf %37, %38 : vector<64x8xf32>
    %c2_33 = arith.constant 2 : index
    %c0_34 = arith.constant 0 : index
    %c0_35 = arith.constant 0 : index
    %40 = vector.load %arg2[%c2_33, %c0_34, %c0_35] : memref<9x64x1xf32, #tpu.memory_space<vmem>>, vector<1x64x1xf32>
    %41 = vector.shape_cast %40 : vector<1x64x1xf32> to vector<64x1xf32>
    %42 = vector.broadcast %41 : vector<64x1xf32> to vector<64x8xf32>
    %43 = arith.mulf %39, %42 : vector<64x8xf32>
    %c2_36 = arith.constant 2 : index
    %c0_37 = arith.constant 0 : index
    %c0_38 = arith.constant 0 : index
    %44 = vector.load %arg5[%c2_36, %c0_37, %c0_38] : memref<9x8x16xf32, #tpu.memory_space<vmem>>, vector<1x8x16xf32>
    %45 = vector.shape_cast %44 : vector<1x8x16xf32> to vector<8x16xf32>
    %cst_39 = arith.constant dense<0.000000e+00> : vector<64x16xf32>
    %46 = tpu.matmul %43, %45, %cst_39 {dimension_numbers = #tpu.dot_dimension_numbers<[1], [0], [0], [1], [0, 0, 1, 1], [], []>} : vector<64x8xf32>, vector<8x16xf32>, vector<64x16xf32> -> vector<64x16xf32>
    %47 = arith.addf %32, %46 : vector<64x16xf32>
    %c0_40 = arith.constant 0 : index
    %c3 = arith.constant 3 : index
    %c0_41 = arith.constant 0 : index
    %c0_42 = arith.constant 0 : index
    %48 = vector.load %arg1[%c0_40, %c3, %c0_41, %c0_42] : memref<1x9x64x9xf32, #tpu.memory_space<vmem>>, vector<1x1x64x9xf32>
    %49 = vector.shape_cast %48 : vector<1x1x64x9xf32> to vector<64x9xf32>
    %cst_43 = arith.constant dense<0.000000e+00> : vector<64x8xf32>
    %50 = tpu.matmul %49, %0, %cst_43 {dimension_numbers = #tpu.dot_dimension_numbers<[1], [0], [0], [1], [0, 0, 1, 1], [], []>} : vector<64x9xf32>, vector<9x8xf32>, vector<64x8xf32> -> vector<64x8xf32>
    %51 = vector.broadcast %1 : vector<1x8xf32> to vector<64x8xf32>
    %52 = arith.addf %50, %51 : vector<64x8xf32>
    %cst_44 = arith.constant 0.000000e+00 : f32
    %53 = vector.broadcast %cst_44 : f32 to vector<64x8xf32>
    %54 = arith.maximumf %52, %53 : vector<64x8xf32>
    %c3_45 = arith.constant 3 : index
    %c0_46 = arith.constant 0 : index
    %c0_47 = arith.constant 0 : index
    %55 = vector.load %arg2[%c3_45, %c0_46, %c0_47] : memref<9x64x1xf32, #tpu.memory_space<vmem>>, vector<1x64x1xf32>
    %56 = vector.shape_cast %55 : vector<1x64x1xf32> to vector<64x1xf32>
    %57 = vector.broadcast %56 : vector<64x1xf32> to vector<64x8xf32>
    %58 = arith.mulf %54, %57 : vector<64x8xf32>
    %c3_48 = arith.constant 3 : index
    %c0_49 = arith.constant 0 : index
    %c0_50 = arith.constant 0 : index
    %59 = vector.load %arg5[%c3_48, %c0_49, %c0_50] : memref<9x8x16xf32, #tpu.memory_space<vmem>>, vector<1x8x16xf32>
    %60 = vector.shape_cast %59 : vector<1x8x16xf32> to vector<8x16xf32>
    %cst_51 = arith.constant dense<0.000000e+00> : vector<64x16xf32>
    %61 = tpu.matmul %58, %60, %cst_51 {dimension_numbers = #tpu.dot_dimension_numbers<[1], [0], [0], [1], [0, 0, 1, 1], [], []>} : vector<64x8xf32>, vector<8x16xf32>, vector<64x16xf32> -> vector<64x16xf32>
    %62 = arith.addf %47, %61 : vector<64x16xf32>
    %c0_52 = arith.constant 0 : index
    %c4 = arith.constant 4 : index
    %c0_53 = arith.constant 0 : index
    %c0_54 = arith.constant 0 : index
    %63 = vector.load %arg1[%c0_52, %c4, %c0_53, %c0_54] : memref<1x9x64x9xf32, #tpu.memory_space<vmem>>, vector<1x1x64x9xf32>
    %64 = vector.shape_cast %63 : vector<1x1x64x9xf32> to vector<64x9xf32>
    %cst_55 = arith.constant dense<0.000000e+00> : vector<64x8xf32>
    %65 = tpu.matmul %64, %0, %cst_55 {dimension_numbers = #tpu.dot_dimension_numbers<[1], [0], [0], [1], [0, 0, 1, 1], [], []>} : vector<64x9xf32>, vector<9x8xf32>, vector<64x8xf32> -> vector<64x8xf32>
    %66 = vector.broadcast %1 : vector<1x8xf32> to vector<64x8xf32>
    %67 = arith.addf %65, %66 : vector<64x8xf32>
    %cst_56 = arith.constant 0.000000e+00 : f32
    %68 = vector.broadcast %cst_56 : f32 to vector<64x8xf32>
    %69 = arith.maximumf %67, %68 : vector<64x8xf32>
    %c4_57 = arith.constant 4 : index
    %c0_58 = arith.constant 0 : index
    %c0_59 = arith.constant 0 : index
    %70 = vector.load %arg2[%c4_57, %c0_58, %c0_59] : memref<9x64x1xf32, #tpu.memory_space<vmem>>, vector<1x64x1xf32>
    %71 = vector.shape_cast %70 : vector<1x64x1xf32> to vector<64x1xf32>
    %72 = vector.broadcast %71 : vector<64x1xf32> to vector<64x8xf32>
    %73 = arith.mulf %69, %72 : vector<64x8xf32>
    %c4_60 = arith.constant 4 : index
    %c0_61 = arith.constant 0 : index
    %c0_62 = arith.constant 0 : index
    %74 = vector.load %arg5[%c4_60, %c0_61, %c0_62] : memref<9x8x16xf32, #tpu.memory_space<vmem>>, vector<1x8x16xf32>
    %75 = vector.shape_cast %74 : vector<1x8x16xf32> to vector<8x16xf32>
    %cst_63 = arith.constant dense<0.000000e+00> : vector<64x16xf32>
    %76 = tpu.matmul %73, %75, %cst_63 {dimension_numbers = #tpu.dot_dimension_numbers<[1], [0], [0], [1], [0, 0, 1, 1], [], []>} : vector<64x8xf32>, vector<8x16xf32>, vector<64x16xf32> -> vector<64x16xf32>
    %77 = arith.addf %62, %76 : vector<64x16xf32>
    %c0_64 = arith.constant 0 : index
    %c5 = arith.constant 5 : index
    %c0_65 = arith.constant 0 : index
    %c0_66 = arith.constant 0 : index
    %78 = vector.load %arg1[%c0_64, %c5, %c0_65, %c0_66] : memref<1x9x64x9xf32, #tpu.memory_space<vmem>>, vector<1x1x64x9xf32>
    %79 = vector.shape_cast %78 : vector<1x1x64x9xf32> to vector<64x9xf32>
    %cst_67 = arith.constant dense<0.000000e+00> : vector<64x8xf32>
    %80 = tpu.matmul %79, %0, %cst_67 {dimension_numbers = #tpu.dot_dimension_numbers<[1], [0], [0], [1], [0, 0, 1, 1], [], []>} : vector<64x9xf32>, vector<9x8xf32>, vector<64x8xf32> -> vector<64x8xf32>
    %81 = vector.broadcast %1 : vector<1x8xf32> to vector<64x8xf32>
    %82 = arith.addf %80, %81 : vector<64x8xf32>
    %cst_68 = arith.constant 0.000000e+00 : f32
    %83 = vector.broadcast %cst_68 : f32 to vector<64x8xf32>
    %84 = arith.maximumf %82, %83 : vector<64x8xf32>
    %c5_69 = arith.constant 5 : index
    %c0_70 = arith.constant 0 : index
    %c0_71 = arith.constant 0 : index
    %85 = vector.load %arg2[%c5_69, %c0_70, %c0_71] : memref<9x64x1xf32, #tpu.memory_space<vmem>>, vector<1x64x1xf32>
    %86 = vector.shape_cast %85 : vector<1x64x1xf32> to vector<64x1xf32>
    %87 = vector.broadcast %86 : vector<64x1xf32> to vector<64x8xf32>
    %88 = arith.mulf %84, %87 : vector<64x8xf32>
    %c5_72 = arith.constant 5 : index
    %c0_73 = arith.constant 0 : index
    %c0_74 = arith.constant 0 : index
    %89 = vector.load %arg5[%c5_72, %c0_73, %c0_74] : memref<9x8x16xf32, #tpu.memory_space<vmem>>, vector<1x8x16xf32>
    %90 = vector.shape_cast %89 : vector<1x8x16xf32> to vector<8x16xf32>
    %cst_75 = arith.constant dense<0.000000e+00> : vector<64x16xf32>
    %91 = tpu.matmul %88, %90, %cst_75 {dimension_numbers = #tpu.dot_dimension_numbers<[1], [0], [0], [1], [0, 0, 1, 1], [], []>} : vector<64x8xf32>, vector<8x16xf32>, vector<64x16xf32> -> vector<64x16xf32>
    %92 = arith.addf %77, %91 : vector<64x16xf32>
    %c0_76 = arith.constant 0 : index
    %c6 = arith.constant 6 : index
    %c0_77 = arith.constant 0 : index
    %c0_78 = arith.constant 0 : index
    %93 = vector.load %arg1[%c0_76, %c6, %c0_77, %c0_78] : memref<1x9x64x9xf32, #tpu.memory_space<vmem>>, vector<1x1x64x9xf32>
    %94 = vector.shape_cast %93 : vector<1x1x64x9xf32> to vector<64x9xf32>
    %cst_79 = arith.constant dense<0.000000e+00> : vector<64x8xf32>
    %95 = tpu.matmul %94, %0, %cst_79 {dimension_numbers = #tpu.dot_dimension_numbers<[1], [0], [0], [1], [0, 0, 1, 1], [], []>} : vector<64x9xf32>, vector<9x8xf32>, vector<64x8xf32> -> vector<64x8xf32>
    %96 = vector.broadcast %1 : vector<1x8xf32> to vector<64x8xf32>
    %97 = arith.addf %95, %96 : vector<64x8xf32>
    %cst_80 = arith.constant 0.000000e+00 : f32
    %98 = vector.broadcast %cst_80 : f32 to vector<64x8xf32>
    %99 = arith.maximumf %97, %98 : vector<64x8xf32>
    %c6_81 = arith.constant 6 : index
    %c0_82 = arith.constant 0 : index
    %c0_83 = arith.constant 0 : index
    %100 = vector.load %arg2[%c6_81, %c0_82, %c0_83] : memref<9x64x1xf32, #tpu.memory_space<vmem>>, vector<1x64x1xf32>
    %101 = vector.shape_cast %100 : vector<1x64x1xf32> to vector<64x1xf32>
    %102 = vector.broadcast %101 : vector<64x1xf32> to vector<64x8xf32>
    %103 = arith.mulf %99, %102 : vector<64x8xf32>
    %c6_84 = arith.constant 6 : index
    %c0_85 = arith.constant 0 : index
    %c0_86 = arith.constant 0 : index
    %104 = vector.load %arg5[%c6_84, %c0_85, %c0_86] : memref<9x8x16xf32, #tpu.memory_space<vmem>>, vector<1x8x16xf32>
    %105 = vector.shape_cast %104 : vector<1x8x16xf32> to vector<8x16xf32>
    %cst_87 = arith.constant dense<0.000000e+00> : vector<64x16xf32>
    %106 = tpu.matmul %103, %105, %cst_87 {dimension_numbers = #tpu.dot_dimension_numbers<[1], [0], [0], [1], [0, 0, 1, 1], [], []>} : vector<64x8xf32>, vector<8x16xf32>, vector<64x16xf32> -> vector<64x16xf32>
    %107 = arith.addf %92, %106 : vector<64x16xf32>
    %c0_88 = arith.constant 0 : index
    %c7 = arith.constant 7 : index
    %c0_89 = arith.constant 0 : index
    %c0_90 = arith.constant 0 : index
    %108 = vector.load %arg1[%c0_88, %c7, %c0_89, %c0_90] : memref<1x9x64x9xf32, #tpu.memory_space<vmem>>, vector<1x1x64x9xf32>
    %109 = vector.shape_cast %108 : vector<1x1x64x9xf32> to vector<64x9xf32>
    %cst_91 = arith.constant dense<0.000000e+00> : vector<64x8xf32>
    %110 = tpu.matmul %109, %0, %cst_91 {dimension_numbers = #tpu.dot_dimension_numbers<[1], [0], [0], [1], [0, 0, 1, 1], [], []>} : vector<64x9xf32>, vector<9x8xf32>, vector<64x8xf32> -> vector<64x8xf32>
    %111 = vector.broadcast %1 : vector<1x8xf32> to vector<64x8xf32>
    %112 = arith.addf %110, %111 : vector<64x8xf32>
    %cst_92 = arith.constant 0.000000e+00 : f32
    %113 = vector.broadcast %cst_92 : f32 to vector<64x8xf32>
    %114 = arith.maximumf %112, %113 : vector<64x8xf32>
    %c7_93 = arith.constant 7 : index
    %c0_94 = arith.constant 0 : index
    %c0_95 = arith.constant 0 : index
    %115 = vector.load %arg2[%c7_93, %c0_94, %c0_95] : memref<9x64x1xf32, #tpu.memory_space<vmem>>, vector<1x64x1xf32>
    %116 = vector.shape_cast %115 : vector<1x64x1xf32> to vector<64x1xf32>
    %117 = vector.broadcast %116 : vector<64x1xf32> to vector<64x8xf32>
    %118 = arith.mulf %114, %117 : vector<64x8xf32>
    %c7_96 = arith.constant 7 : index
    %c0_97 = arith.constant 0 : index
    %c0_98 = arith.constant 0 : index
    %119 = vector.load %arg5[%c7_96, %c0_97, %c0_98] : memref<9x8x16xf32, #tpu.memory_space<vmem>>, vector<1x8x16xf32>
    %120 = vector.shape_cast %119 : vector<1x8x16xf32> to vector<8x16xf32>
    %cst_99 = arith.constant dense<0.000000e+00> : vector<64x16xf32>
    %121 = tpu.matmul %118, %120, %cst_99 {dimension_numbers = #tpu.dot_dimension_numbers<[1], [0], [0], [1], [0, 0, 1, 1], [], []>} : vector<64x8xf32>, vector<8x16xf32>, vector<64x16xf32> -> vector<64x16xf32>
    %122 = arith.addf %107, %121 : vector<64x16xf32>
    %c0_100 = arith.constant 0 : index
    %c8 = arith.constant 8 : index
    %c0_101 = arith.constant 0 : index
    %c0_102 = arith.constant 0 : index
    %123 = vector.load %arg1[%c0_100, %c8, %c0_101, %c0_102] : memref<1x9x64x9xf32, #tpu.memory_space<vmem>>, vector<1x1x64x9xf32>
    %124 = vector.shape_cast %123 : vector<1x1x64x9xf32> to vector<64x9xf32>
    %cst_103 = arith.constant dense<0.000000e+00> : vector<64x8xf32>
    %125 = tpu.matmul %124, %0, %cst_103 {dimension_numbers = #tpu.dot_dimension_numbers<[1], [0], [0], [1], [0, 0, 1, 1], [], []>} : vector<64x9xf32>, vector<9x8xf32>, vector<64x8xf32> -> vector<64x8xf32>
    %126 = vector.broadcast %1 : vector<1x8xf32> to vector<64x8xf32>
    %127 = arith.addf %125, %126 : vector<64x8xf32>
    %cst_104 = arith.constant 0.000000e+00 : f32
    %128 = vector.broadcast %cst_104 : f32 to vector<64x8xf32>
    %129 = arith.maximumf %127, %128 : vector<64x8xf32>
    %c8_105 = arith.constant 8 : index
    %c0_106 = arith.constant 0 : index
    %c0_107 = arith.constant 0 : index
    %130 = vector.load %arg2[%c8_105, %c0_106, %c0_107] : memref<9x64x1xf32, #tpu.memory_space<vmem>>, vector<1x64x1xf32>
    %131 = vector.shape_cast %130 : vector<1x64x1xf32> to vector<64x1xf32>
    %132 = vector.broadcast %131 : vector<64x1xf32> to vector<64x8xf32>
    %133 = arith.mulf %129, %132 : vector<64x8xf32>
    %c8_108 = arith.constant 8 : index
    %c0_109 = arith.constant 0 : index
    %c0_110 = arith.constant 0 : index
    %134 = vector.load %arg5[%c8_108, %c0_109, %c0_110] : memref<9x8x16xf32, #tpu.memory_space<vmem>>, vector<1x8x16xf32>
    %135 = vector.shape_cast %134 : vector<1x8x16xf32> to vector<8x16xf32>
    %cst_111 = arith.constant dense<0.000000e+00> : vector<64x16xf32>
    %136 = tpu.matmul %133, %135, %cst_111 {dimension_numbers = #tpu.dot_dimension_numbers<[1], [0], [0], [1], [0, 0, 1, 1], [], []>} : vector<64x8xf32>, vector<8x16xf32>, vector<64x16xf32> -> vector<64x16xf32>
    %137 = arith.addf %122, %136 : vector<64x16xf32>
    %c0_112 = arith.constant 0 : index
    %c0_113 = arith.constant 0 : index
    %138 = vector.load %arg6[%c0_112, %c0_113] : memref<1x16xf32, #tpu.memory_space<vmem>>, vector<1x16xf32>
    %139 = vector.broadcast %138 : vector<1x16xf32> to vector<64x16xf32>
    %140 = arith.addf %137, %139 : vector<64x16xf32>
    %cst_114 = arith.constant 0.000000e+00 : f32
    %141 = vector.broadcast %cst_114 : f32 to vector<64x16xf32>
    %142 = arith.maximumf %140, %141 : vector<64x16xf32>
    %cst_115 = arith.constant dense<0.000000e+00> : vector<16xf32>
    %143 = vector.multi_reduction <add>, %142, %cst_115 [0] : vector<64x16xf32> to vector<16xf32>
    %144 = vector.shape_cast %143 : vector<16xf32> to vector<1x16xf32>
    %cst_116 = arith.constant 6.400000e+01 : f32
    %145 = vector.broadcast %cst_116 : f32 to vector<1x16xf32>
    %146 = arith.divf %144, %145 : vector<1x16xf32>
    %147 = vector.shape_cast %146 : vector<1x16xf32> to vector<1x16xf32>
    %148 = vector.broadcast %147 : vector<1x16xf32> to vector<8x16xf32>
    %c0_117 = arith.constant 0 : index
    %c0_118 = arith.constant 0 : index
    %149 = vector.load %arg7[%c0_117, %c0_118] : memref<16x32xf32, #tpu.memory_space<vmem>>, vector<16x32xf32>
    %cst_119 = arith.constant dense<0.000000e+00> : vector<8x32xf32>
    %150 = tpu.matmul %148, %149, %cst_119 {dimension_numbers = #tpu.dot_dimension_numbers<[1], [0], [0], [1], [0, 0, 1, 1], [], []>} : vector<8x16xf32>, vector<16x32xf32>, vector<8x32xf32> -> vector<8x32xf32>
    %c0_120 = arith.constant 0 : index
    %c0_121 = arith.constant 0 : index
    %151 = vector.load %arg8[%c0_120, %c0_121] : memref<1x32xf32, #tpu.memory_space<vmem>>, vector<1x32xf32>
    %152 = vector.broadcast %151 : vector<1x32xf32> to vector<8x32xf32>
    %153 = arith.addf %150, %152 : vector<8x32xf32>
    %c0_122 = arith.constant 0 : index
    %c0_123 = arith.constant 0 : index
    %154 = vector.load %arg11[%c0_122, %c0_123] : memref<32x16xf32, #tpu.memory_space<vmem>>, vector<32x16xf32>
    %cst_124 = arith.constant dense<0.000000e+00> : vector<8x16xf32>
    %155 = tpu.matmul %153, %154, %cst_124 {dimension_numbers = #tpu.dot_dimension_numbers<[1], [0], [0], [1], [0, 0, 1, 1], [], []>} : vector<8x32xf32>, vector<32x16xf32>, vector<8x16xf32> -> vector<8x16xf32>
    %156 = vector.extract_strided_slice %155 {offsets = [0, 0], sizes = [1, 16], strides = [1, 1]} : vector<8x16xf32> to vector<1x16xf32>
    %c0_125 = arith.constant 0 : index
    %c0_126 = arith.constant 0 : index
    %157 = vector.load %arg9[%c0_125, %c0_126] : memref<64x3xf32, #tpu.memory_space<vmem>>, vector<64x3xf32>
    %c0_127 = arith.constant 0 : index
    %c0_128 = arith.constant 0 : index
    %158 = vector.load %arg10[%c0_127, %c0_128] : memref<3x16xf32, #tpu.memory_space<vmem>>, vector<3x16xf32>
    %cst_129 = arith.constant dense<0.000000e+00> : vector<64x16xf32>
    %159 = tpu.matmul %157, %158, %cst_129 {dimension_numbers = #tpu.dot_dimension_numbers<[1], [0], [0], [1], [0, 0, 1, 1], [], []>} : vector<64x3xf32>, vector<3x16xf32>, vector<64x16xf32> -> vector<64x16xf32>
    %160 = vector.broadcast %156 : vector<1x16xf32> to vector<64x16xf32>
    %161 = arith.addf %159, %160 : vector<64x16xf32>
    %c0_130 = arith.constant 0 : index
    %c0_131 = arith.constant 0 : index
    %162 = vector.load %arg12[%c0_130, %c0_131] : memref<1x16xf32, #tpu.memory_space<vmem>>, vector<1x16xf32>
    %163 = vector.broadcast %162 : vector<1x16xf32> to vector<64x16xf32>
    %164 = arith.addf %161, %163 : vector<64x16xf32>
    %cst_132 = arith.constant 0.000000e+00 : f32
    %165 = vector.broadcast %cst_132 : f32 to vector<64x16xf32>
    %166 = arith.cmpf ogt, %164, %165 : vector<64x16xf32>
    %cst_133 = arith.constant 2.000000e-02 : f32
    %167 = vector.broadcast %cst_133 : f32 to vector<64x16xf32>
    %168 = arith.mulf %167, %164 : vector<64x16xf32>
    %169 = arith.select %166, %164, %168 : vector<64x16xi1>, vector<64x16xf32>
    %c0_134 = arith.constant 0 : index
    %c0_135 = arith.constant 0 : index
    %170 = vector.load %arg13[%c0_134, %c0_135] : memref<16x16xf32, #tpu.memory_space<vmem>>, vector<16x16xf32>
    %cst_136 = arith.constant dense<0.000000e+00> : vector<64x16xf32>
    %171 = tpu.matmul %169, %170, %cst_136 {dimension_numbers = #tpu.dot_dimension_numbers<[1], [0], [0], [1], [0, 0, 1, 1], [], []>} : vector<64x16xf32>, vector<16x16xf32>, vector<64x16xf32> -> vector<64x16xf32>
    %c0_137 = arith.constant 0 : index
    %c0_138 = arith.constant 0 : index
    %172 = vector.load %arg14[%c0_137, %c0_138] : memref<1x16xf32, #tpu.memory_space<vmem>>, vector<1x16xf32>
    %173 = vector.broadcast %172 : vector<1x16xf32> to vector<64x16xf32>
    %174 = arith.addf %171, %173 : vector<64x16xf32>
    %cst_139 = arith.constant 0.000000e+00 : f32
    %175 = vector.broadcast %cst_139 : f32 to vector<64x16xf32>
    %176 = arith.cmpf ogt, %174, %175 : vector<64x16xf32>
    %cst_140 = arith.constant 2.000000e-02 : f32
    %177 = vector.broadcast %cst_140 : f32 to vector<64x16xf32>
    %178 = arith.mulf %177, %174 : vector<64x16xf32>
    %179 = arith.select %176, %174, %178 : vector<64x16xi1>, vector<64x16xf32>
    %c0_141 = arith.constant 0 : index
    %c0_142 = arith.constant 0 : index
    %180 = vector.load %arg15[%c0_141, %c0_142] : memref<16x3xf32, #tpu.memory_space<vmem>>, vector<16x3xf32>
    %cst_143 = arith.constant dense<0.000000e+00> : vector<64x3xf32>
    %181 = tpu.matmul %179, %180, %cst_143 {dimension_numbers = #tpu.dot_dimension_numbers<[1], [0], [0], [1], [0, 0, 1, 1], [], []>} : vector<64x16xf32>, vector<16x3xf32>, vector<64x3xf32> -> vector<64x3xf32>
    %c0_144 = arith.constant 0 : index
    %c0_145 = arith.constant 0 : index
    %182 = vector.load %arg16[%c0_144, %c0_145] : memref<1x3xf32, #tpu.memory_space<vmem>>, vector<1x3xf32>
    %183 = vector.broadcast %182 : vector<1x3xf32> to vector<64x3xf32>
    %184 = arith.addf %181, %183 : vector<64x3xf32>
    %185 = arith.addf %184, %157 : vector<64x3xf32>
    %c0_146 = arith.constant 0 : index
    %c0_147 = arith.constant 0 : index
    %c0_148 = arith.constant 0 : index
    %186 = vector.load %arg17[%c0_146, %c0_147, %c0_148] : memref<1x64x3xf32, #tpu.memory_space<vmem>>, vector<1x64x3xf32>
    %187 = vector.shape_cast %186 : vector<1x64x3xf32> to vector<64x3xf32>
    %188 = vector.shape_cast %185 : vector<64x3xf32> to vector<1x64x3xf32>
    tpu.vector_store %arg17[%c0_146, %c0_147, %c0_148], %188 {strides = array<i32>} : memref<1x64x3xf32, #tpu.memory_space<vmem>>, vector<1x64x3xf32>,
    return
  }
  func.func @transform_0(%arg0: i32) -> (i32, i32, i32, i32) {
    %c0_i32 = arith.constant 0 : i32
    %c0_i32_0 = arith.constant 0 : i32
    %c0_i32_1 = arith.constant 0 : i32
    %c0_i32_2 = arith.constant 0 : i32
    return %arg0, %c0_i32, %c0_i32_0, %c0_i32_1 : i32, i32, i32, i32
  }
  func.func @transform_1(%arg0: i32) -> (i32, i32, i32) {
    %c0_i32 = arith.constant 0 : i32
    %c0_i32_0 = arith.constant 0 : i32
    %c0_i32_1 = arith.constant 0 : i32
    %c0_i32_2 = arith.constant 0 : i32
    return %c0_i32, %c0_i32_0, %c0_i32_1 : i32, i32, i32
  }
  func.func @transform_2(%arg0: i32) -> (i32, i32) {
    %c0_i32 = arith.constant 0 : i32
    %c0_i32_0 = arith.constant 0 : i32
    %c0_i32_1 = arith.constant 0 : i32
    return %c0_i32, %c0_i32_0 : i32, i32
  }
  func.func @transform_3(%arg0: i32) -> (i32, i32) {
    %c0_i32 = arith.constant 0 : i32
    %c0_i32_0 = arith.constant 0 : i32
    %c0_i32_1 = arith.constant 0 : i32
    return %c0_i32, %c0_i32_0 : i32, i32
  }
  func.func @transform_4(%arg0: i32) -> (i32, i32, i32) {
    %c0_i32 = arith.constant 0 : i32
    %c0_i32_0 = arith.constant 0 : i32
    %c0_i32_1 = arith.constant 0 : i32
    %c0_i32_2 = arith.constant 0 : i32
    return %c0_i32, %c0_i32_0, %c0_i32_1 : i32, i32, i32
  }
  func.func @transform_5(%arg0: i32) -> (i32, i32) {
    %c0_i32 = arith.constant 0 : i32
    %c0_i32_0 = arith.constant 0 : i32
    %c0_i32_1 = arith.constant 0 : i32
    return %c0_i32, %c0_i32_0 : i32, i32
  }
  func.func @transform_6(%arg0: i32) -> (i32, i32) {
    %c0_i32 = arith.constant 0 : i32
    %c0_i32_0 = arith.constant 0 : i32
    %c0_i32_1 = arith.constant 0 : i32
    return %c0_i32, %c0_i32_0 : i32, i32
  }
  func.func @transform_7(%arg0: i32) -> (i32, i32) {
    %c0_i32 = arith.constant 0 : i32
    %c0_i32_0 = arith.constant 0 : i32
    %c0_i32_1 = arith.constant 0 : i32
    return %c0_i32, %c0_i32_0 : i32, i32
  }
  func.func @transform_8(%arg0: i32) -> (i32, i32) {
    %c0_i32 = arith.constant 0 : i32
    %c0_i32_0 = arith.constant 0 : i32
    %c0_i32_1 = arith.constant 0 : i32
    return %c0_i32, %c0_i32_0 : i32, i32
  }
  func.func @transform_9(%arg0: i32) -> (i32, i32) {
    %c0_i32 = arith.constant 0 : i32
    %c0_i32_0 = arith.constant 0 : i32
    %c0_i32_1 = arith.constant 0 : i32
    return %c0_i32, %c0_i32_0 : i32, i32
  }
  func.func @transform_10(%arg0: i32) -> (i32, i32) {
    %c0_i32 = arith.constant 0 : i32
    %c0_i32_0 = arith.constant 0 : i32
    %c0_i32_1 = arith.constant 0 : i32
    return %c0_i32, %c0_i32_0 : i32, i32
  }
  func.func @transform_11(%arg0: i32) -> (i32, i32) {
    %c0_i32 = arith.constant 0 : i32
    %c0_i32_0 = arith.constant 0 : i32
    %c0_i32_1 = arith.constant 0 : i32
    return %c0_i32, %c0_i32_0 : i32, i32
  }
  func.func @transform_12(%arg0: i32) -> (i32, i32) {
    %c0_i32 = arith.constant 0 : i32
    %c0_i32_0 = arith.constant 0 : i32
    %c0_i32_1 = arith.constant 0 : i32
    return %c0_i32, %c0_i32_0 : i32, i32
  }
  func.func @transform_13(%arg0: i32) -> (i32, i32) {
    %c0_i32 = arith.constant 0 : i32
    %c0_i32_0 = arith.constant 0 : i32
    %c0_i32_1 = arith.constant 0 : i32
    return %c0_i32, %c0_i32_0 : i32, i32
  }
  func.func @transform_14(%arg0: i32) -> (i32, i32) {
    %c0_i32 = arith.constant 0 : i32
    %c0_i32_0 = arith.constant 0 : i32
    %c0_i32_1 = arith.constant 0 : i32
    return %c0_i32, %c0_i32_0 : i32, i32
  }
  func.func @transform_15(%arg0: i32) -> (i32, i32) {
    %c0_i32 = arith.constant 0 : i32
    %c0_i32_0 = arith.constant 0 : i32
    %c0_i32_1 = arith.constant 0 : i32
    return %c0_i32, %c0_i32_0 : i32, i32
  }
  func.func @transform_16(%arg0: i32) -> (i32, i32, i32) {
    %c0_i32 = arith.constant 0 : i32
    %c0_i32_0 = arith.constant 0 : i32
    %c0_i32_1 = arith.constant 0 : i32
    return %arg0, %c0_i32, %c0_i32_0 : i32, i32, i32
  }
}

</mosaic_0001>

<bundles_post_ra>
// kernel: scorp_forward.1
= control target key start
LH: loop header
LB: loop body
LE: loop exit
PB: predicated region body
PF: predicated region fallthrough
CT: control target
= control target key end

     0   :  { %s5484_s21 = smov 0   ;;  %s6407_s0 = inlined_call_operand.vmem [shape: f32[2,9,64,9], index: 0, kind: input, shape index: {}]   ;;  %s6408_s1 = inlined_call_operand.vmem [shape: f32[9,64,1], index: 1, kind: input, shape index: {}]   ;;  %s6409_s2 = inlined_call_operand.vmem [shape: f32[9,8], index: 2, kind: input, shape index: {}]   ;;  %s6410_s3 = inlined_call_operand.vmem [shape: f32[1,8], index: 3, kind: input, shape index: {}]   ;;  %s6411_s4 = inlined_call_operand.vmem [shape: f32[9,8,16], index: 4, kind: input, shape index: {}]   ;;  %s6412_s5 = inlined_call_operand.vmem [shape: f32[1,16], index: 5, kind: input, shape index: {}]   ;;  %s6413_s6 = inlined_call_operand.vmem [shape: f32[16,32], index: 6, kind: input, shape index: {}]   ;;  %s6414_s7 = inlined_call_operand.vmem [shape: f32[1,32], index: 7, kind: input, shape index: {}]   ;;  %s6415_s8 = inlined_call_operand.vmem [shape: f32[64,3], index: 8, kind: input, shape index: {}]   ;;  %s6416_s9 = inlined_call_operand.vmem [shape: f32[3,16], index: 9, kind: input, shape index: {}]   ;;  %s6417_s10 = inlined_call_operand.vmem [shape: f32[32,16], index: 10, kind: input, shape index: {}]   ;;  %s6418_s11 = inlined_call_operand.vmem [shape: f32[1,16], index: 11, kind: input, shape index: {}]   ;;  %s6419_s12 = inlined_call_operand.vmem [shape: f32[16,16], index: 12, kind: input, shape index: {}]   ;;  %s6420_s13 = inlined_call_operand.vmem [shape: f32[1,16], index: 13, kind: input, shape index: {}]   ;;  %s6421_s14 = inlined_call_operand.vmem [shape: f32[16,3], index: 14, kind: input, shape index: {}]   ;;  %s6422_s15 = inlined_call_operand.vmem [shape: f32[1,3], index: 15, kind: input, shape index: {}]   ;;  %s6423_s16 = inlined_call_operand.vmem [shape: f32[2,64,3], index: 16, kind: output, shape index: {}]  }
   0x1   :  { %6424 = sst [smem:[#allocation2_spill]] %s6407_s0 }
   0x2 LB: > { %s4360_s22 = sadd.s32 4294967295, %s5392_s21   ;;  %p4364_p0 = scmp.ge.s32.totalorder %s5392_s21, 1  ;;  %s5392_s21 = sphi %s5484_s21, %s26_s21  }
   0x3   : > { %p462_p1 = scmp.lt.s32.totalorder %s5392_s21, 3 }
   0x5   : > { %p463_p2 = pnand %p4364_p0, %p462_p1 }
   0x6   : > { %v4397_v0 = vld [vmem:[%s6408_s1 + $0x50] sm:$0xff] (!%p463_p2)  ;;  %v4395_v1 = vld [vmem:[%s6408_s1 + $0x40] sm:$0xff] (!%p463_p2)  ;;  %vm564_vm0 = vcmask (!%p463_p2), 1040384   ;;  %v5394_v3 = vmov (!%p463_p2), 0   ;;  %v523_v4 = vld [vmem:[%s6409_s2 + $0x8] sm:$0x1] (!%p463_p2) }
   0x7   : > { %466 = sbr.rel (%p463_p2) target bundleno = 1505 (0x5e1), region = 84  ;;  %v522_v2 = vld [vmem:[%s6409_s2] sm:$0xff] (!%p463_p2)  ;;  %5385 = vset.pattern.permute.xlu1 (!%p463_p2), %v5394_v3  ;;  %5384 = vset.pattern.permute.xlu0 (!%p463_p2), %v5394_v3  ;;  %vm5395_vm1 = vmmov (!%p463_p2), 1   ;;  %p512_p3 = scmp.lt.s32.totalorder (!%p463_p2), %s4360_s22, 1  ;;  %v4398_v7 = vld [vmem:[%s6408_s1 + $0x58] sm:$0xff] (!%p463_p2)  ;;  %v4396_v8 = vld [vmem:[%s6408_s1 + $0x48] sm:$0xff] (!%p463_p2) }
   0x8   : > { %vm5504_vm2 = vmpackc.low (!%p463_p2), %vm564_vm0, %vm5395_vm1  ;;  %905 = vperm.xlu1 (!%p463_p2), %5385, %v4397_v0   ;;  %895 = vperm.xlu0 (!%p463_p2), %5384, %v4395_v1   ;;  %v5508_v6 = vpack.c.bf16 (!%p463_p2), %v523_v4, %v522_v2  ;;  %vm539_vm3 = vcmask (!%p463_p2), 72704   ;;  %s6427_s25 = sld [smem:[#allocation2_spill]] (!%p463_p2)  ;;  %v4400_v9 = vld [vmem:[%s6408_s1 + $0x68] sm:$0xff] (!%p463_p2)  ;;  %v4399_v10 = vld [vmem:[%s6408_s1 + $0x60] sm:$0xff] (!%p463_p2)  ;;  %vm943_vm4 = vcmask (!%p463_p2), 64512   ;;  %vm5397_vm5 = vmmov (!%p463_p2), 0  }
   0x9   : > { %v4402_v19 = vld [vmem:[%s6408_s1 + $0x78] sm:$0xff] (!%p463_p2)  ;;  %v4401_v20 = vld [vmem:[%s6408_s1 + $0x70] sm:$0xff] (!%p463_p2)  ;;  %v682_v25 = vld [vmem:[%s6408_s1 + $0x8] sm:$0xff] (!%p463_p2)  ;;  %vm3619_vm6 = vcmask (!%p463_p2), 130048   ;;  %vm3841_vm7 = vcmask (!%p463_p2), 1042432   ;;  %vm3729_vm8 = vcmask (!%p463_p2), 261120  }
   0xa   : > { %5237 = vmatprep.subr.msk.bf16.mxu0 (!%p463_p2), %vm5504_vm2, %v5508_v6  ;;  %5243 = vmatprep.subr.msk.bf16.mxu1 (!%p463_p2), %vm5504_vm2, %v5508_v6  ;;  %v681_v26 = vld [vmem:[%s6408_s1] sm:$0xff] (!%p463_p2)  ;;  %v684_v31 = vld [vmem:[%s6408_s1 + $0x18] sm:$0xff] (!%p463_p2)  ;;  %v683_v32 = vld [vmem:[%s6408_s1 + $0x10] sm:$0xff] (!%p463_p2)  ;;  %vm3816_vm9 = vcmask (!%p463_p2), 23552  }
   0xb   : > { %5240 = vmatpush3.bf16.msk.msra.mxu0 (!%p463_p2), %vm5504_vm2, %v5508_v6  ;;  %5246 = vmatpush3.bf16.msk.msra.mxu1 (!%p463_p2), %vm5504_vm2, %v5508_v6  ;;  %v686_v35 = vld [vmem:[%s6408_s1 + $0x28] sm:$0xff] (!%p463_p2)  ;;  %v685_v36 = vld [vmem:[%s6408_s1 + $0x20] sm:$0xff] (!%p463_p2)  ;;  %v688_v39 = vld [vmem:[%s6408_s1 + $0x38] sm:$0xff] (!%p463_p2) }
   0xc   : > { %910 = vperm.xlu1 (!%p463_p2), %5385, %v4398_v7   ;;  %900 = vperm.xlu0 (!%p463_p2), %5384, %v4396_v8   ;;  %v687_v40 = vld [vmem:[%s6408_s1 + $0x30] sm:$0xff] (!%p463_p2)  ;;  %v4438_v43 = vld [vmem:[%s6408_s1 + $0x88] sm:$0xff] (!%p463_p2)  ;;  %v4437_v44 = vld [vmem:[%s6408_s1 + $0x80] sm:$0xff] (!%p463_p2) }
   0xd   : > { %5249 = vmatprep.subr.msk.bf16.mxu1 (!%p463_p2), %vm5504_vm2, %v5508_v6  ;;  %v4440_v47 = vld [vmem:[%s6408_s1 + $0x98] sm:$0xff] (!%p463_p2)  ;;  %v4439_v48 = vld [vmem:[%s6408_s1 + $0x90] sm:$0xff] (!%p463_p2)  ;;  %v4442_v51 = vld [vmem:[%s6408_s1 + $0xa8] sm:$0xff] (!%p463_p2) }
   0xe   : > { %s6429_s22 = smov (!%p512_p3, %s4360_s22), 1  ;;  %v4441_v52 = vld [vmem:[%s6408_s1 + $0xa0] sm:$0xff]  ;;  %v4444_v55 = vld [vmem:[%s6408_s1 + $0xb8] sm:$0xff]  ;;  %v4443_v56 = vld [vmem:[%s6408_s1 + $0xb0] sm:$0xff] }
   0xf   : > { %s5370_s20 = smul.u32 576, %s6429_s22  ;;  %v4472_v59 = vld [vmem:[%s6408_s1 + $0xc8] sm:$0xff]  ;;  %v4471_v60 = vld [vmem:[%s6408_s1 + $0xc0] sm:$0xff]  ;;  %v4474_v63 = vld [vmem:[%s6408_s1 + $0xd8] sm:$0xff]  ;;  %s4692_s18 = sshll.u32 %s6429_s22, 6 }
  0x10   : > { %920 = vperm.xlu1 %5385, %v4400_v9   ;;  %915 = vperm.xlu0 %5384, %v4399_v10   ;;  %v4473_v0 = vld [vmem:[%s6408_s1 + $0xd0] sm:$0xff]  ;;  %v4476_v3 = vld [vmem:[%s6408_s1 + $0xe8] sm:$0xff]  ;;  %v4475_v4 = vld [vmem:[%s6408_s1 + $0xe0] sm:$0xff]  ;;  %s521_s23 = scalar_lea.vmem %s6423_s16, %s4692_s18 }
  0x11   : > { %s5534_s26 = scalar_lea.vmem %s6427_s25, %s5370_s20  ;;  %v4478_v9 = vld [vmem:[%s6408_s1 + $0xf8] sm:$0xff]  ;;  %v4477_v10 = vld [vmem:[%s6408_s1 + $0xf0] sm:$0xff]  ;;  %v4607_v5 = vld [vmem:[%s6408_s1 + $0x1c0] sm:$0xff] }
  0x12   : > { %v525_v11 = vld [vmem:[%s5534_s26] sm:$0xff]  ;;  %v526_v13 = vld [vmem:[%s5534_s26 + $0x8] sm:$0xff]  ;;  %v527_v15 = vld [vmem:[%s5534_s26 + $0x10] sm:$0xff] }
  0x13   : > { %v4378_v12 = vld [vmem:[%s5534_s26 + $0x40] sm:$0xff]  ;;  %4905 = vmatprep.mubr.msk.f32.mxu0 %vm539_vm3, %v525_v11  ;;  %v4379_v14 = vld [vmem:[%s5534_s26 + $0x48] sm:$0xff]  ;;  %v4380_v16 = vld [vmem:[%s5534_s26 + $0x50] sm:$0xff] }
  0x14   : > { %4921 = vmatprep.mubr.msk.f32.mxu1 %vm539_vm3, %v4378_v12  ;;  %4906 = vmatmul.mubr.msk.f32.vlgmr.msra.gmra.mrb[0].mxu0 %vm539_vm3, %v526_v13  ;;  %v528_v17 = vld [vmem:[%s5534_s26 + $0x18] sm:$0xff]  ;;  %v529_v21 = vld [vmem:[%s5534_s26 + $0x20] sm:$0xff]  ;;  %v530_v23 = vld [vmem:[%s5534_s26 + $0x28] sm:$0xff] }
  0x15   : > { %4922 = vmatmul.mubr.msk.f32.vlgmr.msra.gmra.mrb[0].mxu1 %vm539_vm3, %v4379_v14  ;;  %v4381_v18 = vld [vmem:[%s5534_s26 + $0x58] sm:$0xff]  ;;  %4908 = vmatprep.mubr.msk.f32.mxu0 %vm539_vm3, %v527_v15  ;;  %v4382_v22 = vld [vmem:[%s5534_s26 + $0x60] sm:$0xff]  ;;  %v4383_v24 = vld [vmem:[%s5534_s26 + $0x68] sm:$0xff] }
  0x16   : > { %4924 = vmatprep.mubr.msk.f32.mxu1 %vm539_vm3, %v4380_v16  ;;  %5252 = vmatpush3.bf16.msk.msra.mxu1 %vm5504_vm2, %v5508_v6  ;;  %v531_v27 = vld [vmem:[%s5534_s26 + $0x30] sm:$0xff]  ;;  %v532_v29 = vld [vmem:[%s5534_s26 + $0x38] sm:$0xff]  ;;  %v4420_v33 = vld [vmem:[%s5534_s26 + $0x80] sm:$0xff] }
  0x17   : > { %930 = vperm.xlu1 %5385, %v4402_v19   ;;  %925 = vperm.xlu0 %5384, %v4401_v20   ;;  %v4384_v28 = vld [vmem:[%s5534_s26 + $0x70] sm:$0xff]  ;;  %v4385_v30 = vld [vmem:[%s5534_s26 + $0x78] sm:$0xff]  ;;  %v4421_v34 = vld [vmem:[%s5534_s26 + $0x88] sm:$0xff] }
  0x18   : > { %4909 = vmatmul.mubr.msk.f32.gmra.mrb[2].mxu0 %vm539_vm3, %v528_v17  ;;  %5255 = vmatprep.subr.msk.bf16.mxu1 %vm5504_vm2, %v5508_v6  ;;  %v4422_v37 = vld [vmem:[%s5534_s26 + $0x90] sm:$0xff]  ;;  %v4423_v38 = vld [vmem:[%s5534_s26 + $0x98] sm:$0xff]  ;;  %v4424_v41 = vld [vmem:[%s5534_s26 + $0xa0] sm:$0xff] }
  0x19   : > { %4925 = vmatmul.mubr.msk.f32.gmra.mrb[2].mxu1 %vm539_vm3, %v4381_v18  ;;  %4911 = vmatprep.mubr.msk.f32.mxu0 %vm539_vm3, %v529_v21  ;;  %v4425_v42 = vld [vmem:[%s5534_s26 + $0xa8] sm:$0xff]  ;;  %v4426_v45 = vld [vmem:[%s5534_s26 + $0xb0] sm:$0xff]  ;;  %v4427_v46 = vld [vmem:[%s5534_s26 + $0xb8] sm:$0xff] }
  0x1a   : > { %4927 = vmatprep.mubr.msk.f32.mxu1 %vm539_vm3, %v4382_v22  ;;  %v4454_v49 = vld [vmem:[%s5534_s26 + $0xc0] sm:$0xff]  ;;  %v4455_v50 = vld [vmem:[%s5534_s26 + $0xc8] sm:$0xff]  ;;  %v4456_v53 = vld [vmem:[%s5534_s26 + $0xd0] sm:$0xff] }
  0x1b   : > { %696 = vperm.xlu1 %5385, %v682_v25   ;;  %691 = vperm.xlu0 %5384, %v681_v26   ;;  %v4457_v54 = vld [vmem:[%s5534_s26 + $0xd8] sm:$0xff]  ;;  %v4458_v57 = vld [vmem:[%s5534_s26 + $0xe0] sm:$0xff]  ;;  %v4459_v58 = vld [vmem:[%s5534_s26 + $0xe8] sm:$0xff] }
  0x1c   : > { %4912 = vmatmul.mubr.msk.f32.gmra.mrb[4].mxu0 %vm539_vm3, %v530_v23  ;;  %v4460_v61 = vld [vmem:[%s5534_s26 + $0xf0] sm:$0xff]  ;;  %v4461_v62 = vld [vmem:[%s5534_s26 + $0xf8] sm:$0xff]  ;;  %v4488_v1 = vld [vmem:[%s5534_s26 + $0x100] sm:$0xff] }
  0x1d   : > { %4928 = vmatmul.mubr.msk.f32.gmra.mrb[4].mxu1 %vm539_vm3, %v4383_v24  ;;  %4914 = vmatprep.mubr.msk.f32.mxu0 %vm539_vm3, %v531_v27  ;;  %v4489_v2 = vld [vmem:[%s5534_s26 + $0x108] sm:$0xff]  ;;  %v4490_v7 = vld [vmem:[%s5534_s26 + $0x110] sm:$0xff]  ;;  %v4491_v8 = vld [vmem:[%s5534_s26 + $0x118] sm:$0xff] }
  0x1e   : > { %4930 = vmatprep.mubr.msk.f32.mxu1 %vm539_vm3, %v4384_v28  ;;  %v4492_v11 = vld [vmem:[%s5534_s26 + $0x120] sm:$0xff]  ;;  %v4493_v12 = vld [vmem:[%s5534_s26 + $0x128] sm:$0xff]  ;;  %v4494_v15 = vld [vmem:[%s5534_s26 + $0x130] sm:$0xff] }
  0x1f   : > { %706 = vperm.xlu1 %5385, %v684_v31   ;;  %701 = vperm.xlu0 %5384, %v683_v32   ;;  %v4506_v13 = vld [vmem:[%s6408_s1 + $0x108] sm:$0xff]  ;;  %v4505_v14 = vld [vmem:[%s6408_s1 + $0x100] sm:$0xff]  ;;  %v4495_v16 = vld [vmem:[%s5534_s26 + $0x138] sm:$0xff] }
  0x20   : > { %4915 = vmatmul.mubr.msk.f32.gmra.mrb[6].mxu0 %vm539_vm3, %v532_v29  ;;  %v4508_v17 = vld [vmem:[%s6408_s1 + $0x118] sm:$0xff]  ;;  %v4507_v18 = vld [vmem:[%s6408_s1 + $0x110] sm:$0xff]  ;;  %v4522_v19 = vld [vmem:[%s5534_s26 + $0x140] sm:$0xff] }
  0x21   : > { %4931 = vmatmul.mubr.msk.f32.gmra.mrb[6].mxu1 %vm539_vm3, %v4385_v30  ;;  %v4523_v20 = vld [vmem:[%s5534_s26 + $0x148] sm:$0xff]  ;;  %v4509_v22 = vld [vmem:[%s6408_s1 + $0x120] sm:$0xff]  ;;  %v4524_v23 = vld [vmem:[%s5534_s26 + $0x150] sm:$0xff] }
  0x22   : > { %4965 = vmatprep.mubr.msk.f32.mxu1 %vm539_vm3, %v4420_v33  ;;  %v4510_v21 = vld [vmem:[%s6408_s1 + $0x128] sm:$0xff]  ;;  %v4525_v24 = vld [vmem:[%s5534_s26 + $0x158] sm:$0xff]  ;;  %v4511_v26 = vld [vmem:[%s6408_s1 + $0x130] sm:$0xff] }
  0x23   : > { %716 = vperm.xlu1 %5385, %v686_v35   ;;  %711 = vperm.xlu0 %5384, %v685_v36   ;;  %v4512_v25 = vld [vmem:[%s6408_s1 + $0x138] sm:$0xff]  ;;  %v4526_v27 = vld [vmem:[%s5534_s26 + $0x160] sm:$0xff]  ;;  %v4527_v28 = vld [vmem:[%s5534_s26 + $0x168] sm:$0xff] }
  0x24   : > { %v4540_v29 = vld [vmem:[%s6408_s1 + $0x148] sm:$0xff]  ;;  %v4539_v30 = vld [vmem:[%s6408_s1 + $0x140] sm:$0xff]  ;;  %v4528_v31 = vld [vmem:[%s5534_s26 + $0x170] sm:$0xff] }
  0x25   : > { %4966 = vmatmul.mubr.msk.f32.vlgmr.msra.gmra.mrb[8].mxu1 %vm539_vm3, %v4421_v34  ;;  %v4403_v32 = vld [vmem:[%s6411_s4 + $0x8] sm:$0xff]  ;;  %v4529_v33 = vld [vmem:[%s5534_s26 + $0x178] sm:$0xff]  ;;  %v4541_v35 = vld [vmem:[%s6408_s1 + $0x150] sm:$0xff] }
  0x26   : > { %4968 = vmatprep.mubr.msk.f32.mxu1 %vm539_vm3, %v4422_v37  ;;  %5258 = vmatpush3.bf16.msk.msra.mxu1 %vm5504_vm2, %v5508_v6  ;;  %v4542_v34 = vld [vmem:[%s6408_s1 + $0x158] sm:$0xff]  ;;  %v4556_v36 = vld [vmem:[%s5534_s26 + $0x180] sm:$0xff]  ;;  %v4557_v37 = vld [vmem:[%s5534_s26 + $0x188] sm:$0xff] }
  0x27   : > { %5261 = vmatprep.subr.msk.bf16.mxu1 %vm5504_vm2, %v5508_v6  ;;  %726 = vperm.xlu1 %5385, %v688_v39   ;;  %v4543_v39 = vld [vmem:[%s6408_s1 + $0x160] sm:$0xff] }
  0x28   : > { %721 = vperm.xlu0 %5384, %v687_v40   ;;  %4933 = vmatprep.subr.mxu0 %v4403_v32  ;;  %v4558_v40 = vld [vmem:[%s5534_s26 + $0x190] sm:$0xff] }
  0x29   : > { %4969 = vmatmul.mubr.msk.f32.gmra.mrb[10].mxu1 %vm539_vm3, %v4423_v38  ;;  %4934 = vmatpush3.msra.mxu0 %v4403_v32  ;;  %v4544_v38 = vld [vmem:[%s6408_s1 + $0x168] sm:$0xff] }
  0x2a   : > { %4971 = vmatprep.mubr.msk.f32.mxu1 %vm539_vm3, %v4424_v41  ;;  %v4559_v41 = vld [vmem:[%s5534_s26 + $0x198] sm:$0xff] }
  0x2b   : > { %1364 = vperm.xlu1 %5385, %v4438_v43   ;;  %v4545_v43 = vld [vmem:[%s6408_s1 + $0x170] sm:$0xff] }
  0x2c   : > { %1359 = vperm.xlu0 %5384, %v4437_v44   ;;  %v4560_v44 = vld [vmem:[%s5534_s26 + $0x1a0] sm:$0xff] }
  0x2d   : > { %4972 = vmatmul.mubr.msk.f32.gmra.mrb[12].mxu1 %vm539_vm3, %v4425_v42  ;;  %v4546_v42 = vld [vmem:[%s6408_s1 + $0x178] sm:$0xff] }
  0x2e   : > { %4974 = vmatprep.mubr.msk.f32.mxu1 %vm539_vm3, %v4426_v45  ;;  %v4561_v45 = vld [vmem:[%s5534_s26 + $0x1a8] sm:$0xff] }
  0x2f   : > { %1374 = vperm.xlu1 %5385, %v4440_v47   ;;  %v4573_v47 = vld [vmem:[%s6408_s1 + $0x180] sm:$0xff] }
  0x30   : > { %1369 = vperm.xlu0 %5384, %v4439_v48   ;;  %v4562_v48 = vld [vmem:[%s5534_s26 + $0x1b0] sm:$0xff] }
  0x31   : > { %4975 = vmatmul.mubr.msk.f32.gmra.mrb[14].mxu1 %vm539_vm3, %v4427_v46  ;;  %v4574_v46 = vld [vmem:[%s6408_s1 + $0x188] sm:$0xff] }
  0x32   : > { %4995 = vmatprep.mubr.msk.f32.mxu1 %vm539_vm3, %v4454_v49  ;;  %v4563_v49 = vld [vmem:[%s5534_s26 + $0x1b8] sm:$0xff] }
  0x33   : > { %1384 = vperm.xlu1 %5385, %v4442_v51   ;;  %v4575_v51 = vld [vmem:[%s6408_s1 + $0x190] sm:$0xff] }
  0x34   : > { %1379 = vperm.xlu0 %5384, %v4441_v52   ;;  %v4590_v52 = vld [vmem:[%s5534_s26 + $0x1c0] sm:$0xff] }
  0x35   : > { %4996 = vmatmul.mubr.msk.f32.vlgmr.msra.gmra.mrb[16].mxu1 %vm539_vm3, %v4455_v50  ;;  %v4576_v50 = vld [vmem:[%s6408_s1 + $0x198] sm:$0xff] }
  0x36   : > { %4998 = vmatprep.mubr.msk.f32.mxu1 %vm539_vm3, %v4456_v53  ;;  %5264 = vmatpush3.bf16.msk.msra.mxu1 %vm5504_vm2, %v5508_v6  ;;  %v4591_v53 = vld [vmem:[%s5534_s26 + $0x1c8] sm:$0xff] }
  0x37   : > { %5267 = vmatprep.subr.msk.bf16.mxu1 %vm5504_vm2, %v5508_v6  ;;  %1394 = vperm.xlu1 %5385, %v4444_v55   ;;  %v4577_v55 = vld [vmem:[%s6408_s1 + $0x1a0] sm:$0xff] }
  0x38   : > { %1389 = vperm.xlu0 %5384, %v4443_v56   ;;  %v4592_v56 = vld [vmem:[%s5534_s26 + $0x1d0] sm:$0xff] }
  0x39   : > { %4999 = vmatmul.mubr.msk.f32.gmra.mrb[18].mxu1 %vm539_vm3, %v4457_v54  ;;  %v4578_v54 = vld [vmem:[%s6408_s1 + $0x1a8] sm:$0xff] }
  0x3a   : > { %5001 = vmatprep.mubr.msk.f32.mxu1 %vm539_vm3, %v4458_v57  ;;  %v5848_v57 = vld [vmem:[%s6411_s4] sm:$0xff] }
  0x3b   : > { %1706 = vperm.xlu1 %5385, %v4472_v59   ;;  %v4580_v59 = vld [vmem:[%s6408_s1 + $0x1b8] sm:$0xff]  ;;  %4947 = vmatprep.subr.mxu0 %v5848_v57 }
  0x3c   : > { %1701 = vperm.xlu0 %5384, %v4471_v60   ;;  %v4579_v60 = vld [vmem:[%s6408_s1 + $0x1b0] sm:$0xff] }
  0x3d   : > { %5002 = vmatmul.mubr.msk.f32.gmra.mrb[20].mxu1 %vm539_vm3, %v4459_v58  ;;  %v4593_v58 = vld [vmem:[%s5534_s26 + $0x1d8] sm:$0xff] }
  0x3e   : > { %5004 = vmatprep.mubr.msk.f32.mxu1 %vm539_vm3, %v4460_v61  ;;  %v4594_v61 = vld [vmem:[%s5534_s26 + $0x1e0] sm:$0xff] }
  0x3f   : > { %1716 = vperm.xlu1 %5385, %v4474_v63   ;;  %v4608_v63 = vld [vmem:[%s6408_s1 + $0x1c8] sm:$0xff] }
  0x40   : > { %1711 = vperm.xlu0 %5384, %v4473_v0   ;;  %v4597_v0 = vld [vmem:[%s5534_s26 + $0x1f8] sm:$0xff] }
  0x41   : > { %5005 = vmatmul.mubr.msk.f32.gmra.mrb[22].mxu1 %vm539_vm3, %v4461_v62  ;;  %v4595_v62 = vld [vmem:[%s5534_s26 + $0x1e8] sm:$0xff] }
  0x42   : > { %5025 = vmatprep.mubr.msk.f32.mxu1 %vm539_vm3, %v4488_v1  ;;  %v4610_v1 = vld [vmem:[%s6408_s1 + $0x1d8] sm:$0xff] }
  0x43   : > { %1726 = vperm.xlu1 %5385, %v4476_v3   ;;  %v4624_v3 = vld [vmem:[%s5534_s26 + $0x200] sm:$0xff] }
  0x44   : > { %1721 = vperm.xlu0 %5384, %v4475_v4   ;;  %v4625_v4 = vld [vmem:[%s5534_s26 + $0x208] sm:$0xff] }
  0x45   : > { %5026 = vmatmul.mubr.msk.f32.vlgmr.msra.gmra.mrb[24].mxu1 %vm539_vm3, %v4489_v2  ;;  %v4609_v2 = vld [vmem:[%s6408_s1 + $0x1d0] sm:$0xff] }
  0x46   : > { %5028 = vmatprep.mubr.msk.f32.mxu1 %vm539_vm3, %v4490_v7  ;;  %5270 = vmatpush3.bf16.msk.msra.mxu1 %vm5504_vm2, %v5508_v6  ;;  %v4612_v7 = vld [vmem:[%s6408_s1 + $0x1e8] sm:$0xff] }
  0x47   : > { %5273 = vmatprep.subr.msk.bf16.mxu1 %vm5504_vm2, %v5508_v6  ;;  %1736 = vperm.xlu1 %5385, %v4478_v9   ;;  %v4626_v9 = vld [vmem:[%s5534_s26 + $0x210] sm:$0xff] }
  0x48   : > { %1731 = vperm.xlu0 %5384, %v4477_v10   ;;  %v4627_v10 = vld [vmem:[%s5534_s26 + $0x218] sm:$0xff] }
  0x49   : > { %5029 = vmatmul.mubr.msk.f32.gmra.mrb[26].mxu1 %vm539_vm3, %v4491_v8  ;;  %v4611_v8 = vld [vmem:[%s6408_s1 + $0x1e0] sm:$0xff] }
  0x4a   : > { %5031 = vmatprep.mubr.msk.f32.mxu1 %vm539_vm3, %v4492_v11  ;;  %v4614_v11 = vld [vmem:[%s6408_s1 + $0x1f8] sm:$0xff] }
  0x4b   : > { %2048 = vperm.xlu1 %5385, %v4506_v13   ;;  %v4628_v13 = vld [vmem:[%s5534_s26 + $0x220] sm:$0xff] }
  0x4c   : > { %2043 = vperm.xlu0 %5384, %v4505_v14   ;;  %v4629_v14 = vld [vmem:[%s5534_s26 + $0x228] sm:$0xff] }
  0x4d   : > { %5032 = vmatmul.mubr.msk.f32.gmra.mrb[28].mxu1 %vm539_vm3, %v4493_v12  ;;  %v4613_v12 = vld [vmem:[%s6408_s1 + $0x1f0] sm:$0xff] }
  0x4e   : > { %5034 = vmatprep.mubr.msk.f32.mxu1 %vm539_vm3, %v4494_v15  ;;  %v4642_v15 = vld [vmem:[%s6408_s1 + $0x208] sm:$0xff] }
  0x4f   : > { %2058 = vperm.xlu1 %5385, %v4508_v17   ;;  %v4630_v17 = vld [vmem:[%s5534_s26 + $0x230] sm:$0xff] }
  0x50   : > { %2053 = vperm.xlu0 %5384, %v4507_v18   ;;  %v4631_v18 = vld [vmem:[%s5534_s26 + $0x238] sm:$0xff] }
  0x51   : > { %5035 = vmatmul.mubr.msk.f32.gmra.mrb[30].mxu1 %vm539_vm3, %v4495_v16  ;;  %v4641_v16 = vld [vmem:[%s6408_s1 + $0x200] sm:$0xff] }
  0x52   : > { %5055 = vmatprep.mubr.msk.f32.mxu1 %vm539_vm3, %v4522_v19  ;;  %v4644_v19 = vld [vmem:[%s6408_s1 + $0x218] sm:$0xff] }
  0x53   : > { %2068 = vperm.xlu1 %5385, %v4510_v21   ;;  %v4646_v21 = vld [vmem:[%s6408_s1 + $0x228] sm:$0xff] }
  0x54   : > { %2063 = vperm.xlu0 %5384, %v4509_v22   ;;  %v4645_v22 = vld [vmem:[%s6408_s1 + $0x220] sm:$0xff] }
  0x55   : > { %5056 = vmatmul.mubr.msk.f32.vlgmr.msra.gmra.mrb[32].mxu1 %vm539_vm3, %v4523_v20  ;;  %v4643_v20 = vld [vmem:[%s6408_s1 + $0x210] sm:$0xff] }
  0x56   : > { %5058 = vmatprep.mubr.msk.f32.mxu1 %vm539_vm3, %v4524_v23  ;;  %5276 = vmatpush3.bf16.msk.msra.mxu1 %vm5504_vm2, %v5508_v6  ;;  %v4648_v23 = vld [vmem:[%s6408_s1 + $0x238] sm:$0xff] }
  0x57   : > { %5279 = vmatprep.subr.msk.bf16.mxu1 %vm5504_vm2, %v5508_v6  ;;  %2078 = vperm.xlu1 %5385, %v4512_v25  }
  0x58   : > { %2073 = vperm.xlu0 %5384, %v4511_v26  }
  0x59   : > { %5059 = vmatmul.mubr.msk.f32.gmra.mrb[34].mxu1 %vm539_vm3, %v4525_v24  ;;  %v4647_v24 = vld [vmem:[%s6408_s1 + $0x230] sm:$0xff] }
  0x5a   : > { %5061 = vmatprep.mubr.msk.f32.mxu1 %vm539_vm3, %v4526_v27 }
  0x5b   : > { %2390 = vperm.xlu1 %5385, %v4540_v29  }
  0x5c   : > { %2385 = vperm.xlu0 %5384, %v4539_v30  }
  0x5d   : > { %5062 = vmatmul.mubr.msk.f32.gmra.mrb[36].mxu1 %vm539_vm3, %v4527_v28 }
  0x5e   : > { %5064 = vmatprep.mubr.msk.f32.mxu1 %vm539_vm3, %v4528_v31 }
  0x5f   : > { %2400 = vperm.xlu1 %5385, %v4542_v34  }
  0x60   : > { %2395 = vperm.xlu0 %5384, %v4541_v35  }
  0x61   : > { %5065 = vmatmul.mubr.msk.f32.gmra.mrb[38].mxu1 %vm539_vm3, %v4529_v33 }
  0x62   : > { %5085 = vmatprep.mubr.msk.f32.mxu1 %vm539_vm3, %v4556_v36 }
  0x63   : > { %2410 = vperm.xlu1 %5385, %v4544_v38  }
  0x64   : > { %2405 = vperm.xlu0 %5384, %v4543_v39  }
  0x65   : > { %5086 = vmatmul.mubr.msk.f32.vlgmr.msra.gmra.mrb[40].mxu1 %vm539_vm3, %v4557_v37 }
  0x66   : > { %5088 = vmatprep.mubr.msk.f32.mxu1 %vm539_vm3, %v4558_v40  ;;  %5282 = vmatpush3.bf16.msk.msra.mxu1 %vm5504_vm2, %v5508_v6 }
  0x67   : > { %5285 = vmatprep.subr.msk.bf16.mxu1 %vm5504_vm2, %v5508_v6  ;;  %2420 = vperm.xlu1 %5385, %v4546_v42  }
  0x68   : > { %2415 = vperm.xlu0 %5384, %v4545_v43  }
  0x69   : > { %5089 = vmatmul.mubr.msk.f32.gmra.mrb[42].mxu1 %vm539_vm3, %v4559_v41 }
  0x6a   : > { %5091 = vmatprep.mubr.msk.f32.mxu1 %vm539_vm3, %v4560_v44 }
  0x6b   : > { %2732 = vperm.xlu1 %5385, %v4574_v46  }
  0x6c   : > { %2727 = vperm.xlu0 %5384, %v4573_v47   ;;  %v5974_v47 = vld [vmem:[%s6410_s3] ss:$0 sm:$0xff] }
  0x6d   : > { %5092 = vmatmul.mubr.msk.f32.gmra.mrb[44].mxu1 %vm539_vm3, %v4561_v45 }
  0x6e   : > { %5094 = vmatprep.mubr.msk.f32.mxu1 %vm539_vm3, %v4562_v48 }
  0x6f   : > { %2742 = vperm.xlu1 %5385, %v4576_v50  }
  0x70   : > { %2737 = vperm.xlu0 %5384, %v4575_v51  }
  0x71   : > { %5095 = vmatmul.mubr.msk.f32.gmra.mrb[46].mxu1 %vm539_vm3, %v4563_v49 }
  0x72   : > { %5115 = vmatprep.mubr.msk.f32.mxu1 %vm539_vm3, %v4590_v52 }
  0x73   : > { %2752 = vperm.xlu1 %5385, %v4578_v54  }
  0x74   : > { %2747 = vperm.xlu0 %5384, %v4577_v55  }
  0x75   : > { %5116 = vmatmul.mubr.msk.f32.vlgmr.msra.gmra.mrb[48].mxu1 %vm539_vm3, %v4591_v53 }
  0x76   : > { %5118 = vmatprep.mubr.msk.f32.mxu1 %vm539_vm3, %v4592_v56  ;;  %5288 = vmatpush3.bf16.msk.msra.mxu1 %vm5504_vm2, %v5508_v6  ;;  %v4596_v6 = vld [vmem:[%s5534_s26 + $0x1f0] sm:$0xff] }
  0x77   : > { %2762 = vperm.xlu1 %5385, %v4580_v59  }
  0x78   : > { %2757 = vperm.xlu0 %5384, %v4579_v60  }
  0x79   : > { %5119 = vmatmul.mubr.msk.f32.gmra.mrb[50].mxu1 %vm539_vm3, %v4593_v58 }
  0x7a   : > { %5121 = vmatprep.mubr.msk.f32.mxu1 %vm539_vm3, %v4594_v61 }
  0x7b   : > { %3074 = vperm.xlu1 %5385, %v4608_v63  }
  0x7c   : > { %3069 = vperm.xlu0 %5384, %v4607_v5  }
  0x7d   : > { %5122 = vmatmul.mubr.msk.f32.gmra.mrb[52].mxu1 %vm539_vm3, %v4595_v62 }
  0x7e   : > { %5124 = vmatprep.mubr.msk.f32.mxu1 %vm539_vm3, %v4596_v6 }
  0x7f   : > { %3084 = vperm.xlu1 %5385, %v4610_v1  }
  0x80   : > { %3079 = vperm.xlu0 %5384, %v4609_v2  }
  0x81   : > { %5125 = vmatmul.mubr.msk.f32.gmra.mrb[54].mxu1 %vm539_vm3, %v4597_v0 }
  0x82   : > { %5145 = vmatprep.mubr.msk.f32.mxu1 %vm539_vm3, %v4624_v3 }
  0x83   : > { %3094 = vperm.xlu1 %5385, %v4612_v7  }
  0x84   : > { %3089 = vperm.xlu0 %5384, %v4611_v8  }
  0x85   : > { %5146 = vmatmul.mubr.msk.f32.vlgmr.msra.gmra.mrb[56].mxu1 %vm539_vm3, %v4625_v4 }
  0x86   : > { %5148 = vmatprep.mubr.msk.f32.mxu1 %vm539_vm3, %v4626_v9 }
  0x87   : > { %3104 = vperm.xlu1 %5385, %v4614_v11   ;;  %v896_v25 = vpop.permute.xlu0 %895  ;;  %v906_v26 = vpop.permute.xlu1 %905 }
  0x88   : > { %3099 = vperm.xlu0 %5384, %v4613_v12  }
  0x89   : > { %5149 = vmatmul.mubr.msk.f32.gmra.mrb[58].mxu1 %vm539_vm3, %v4627_v10  ;;  %v4445_v10 = vld [vmem:[%s6411_s4 + $0x10] sm:$0xff] }
  0x8a   : > { %5151 = vmatprep.mubr.msk.f32.mxu1 %vm539_vm3, %v4628_v13 }
  0x8b   : > { %3416 = vperm.xlu1 %5385, %v4642_v15   ;;  %v901_v27 = vpop.permute.xlu0 %900  ;;  %v911_v28 = vpop.permute.xlu1 %910 }
  0x8c   : > { %3411 = vperm.xlu0 %5384, %v4641_v16  }
  0x8d   : > { %5152 = vmatmul.mubr.msk.f32.gmra.mrb[60].mxu1 %vm539_vm3, %v4629_v14 }
  0x8e   : > { %5154 = vmatprep.mubr.msk.f32.mxu1 %vm539_vm3, %v4630_v17 }
  0x8f   : > { %3426 = vperm.xlu1 %5385, %v4644_v19   ;;  %v5935_v29 = vpop.permute.xlu0 %915  ;;  %v5937_v30 = vpop.permute.xlu1 %920 }
  0x90   : > { %3421 = vperm.xlu0 %5384, %v4643_v20  }
  0x91   : > { %5155 = vmatmul.mubr.msk.f32.gmra.mrb[62].mxu1 %vm539_vm3, %v4631_v18 }
  0x93   : > { %3436 = vperm.xlu1 %5385, %v4646_v21  }
  0x94   : > { %3431 = vperm.xlu0 %5384, %v4645_v22  }
  0x96   : > { %v5939_v31 = vpop.permute.xlu0 %925  ;;  %v5941_v32 = vpop.permute.xlu1 %930 }
  0x97   : > { %3446 = vperm.xlu1 %5385, %v4648_v23  }
  0x98   : > { %3441 = vperm.xlu0 %5384, %v4647_v24  }
  0x9a   : > { %v5943_v33 = vpop.permute.xlu0 %691  ;;  %v5945_v34 = vpop.permute.xlu1 %696 }
  0x9e   : > { %v5947_v35 = vpop.permute.xlu0 %701  ;;  %v5949_v36 = vpop.permute.xlu1 %706 }
  0xa2   : > { %v5951_v37 = vpop.permute.xlu0 %711  ;;  %v5953_v38 = vpop.permute.xlu1 %716 }
  0xa6   : > { %v5957_v40 = vpop.permute.xlu1 %726 }
  0xa7   : > { %v5955_v39 = vpop.permute.xlu0 %721 }
  0xaa   : > { %v5961_v42 = vpop.permute.xlu1 %1364 }
  0xab   : > { %v5959_v41 = vpop.permute.xlu0 %1359 }
  0xae   : > { %v5965_v44 = vpop.permute.xlu1 %1374 }
  0xaf   : > { %v5963_v43 = vpop.permute.xlu0 %1369 }
  0xb2   : > { %v5969_v46 = vpop.permute.xlu1 %1384 }
  0xb3   : > { %v5967_v45 = vpop.permute.xlu0 %1379 }
  0xb6   : > { %v5979_v54 = vpop.permute.xlu1 %1394 }
  0xb7   : > { %v5976_v50 = vpop.permute.xlu0 %1389 }
  0xba   : > { %v5986_v7 = vpop.permute.xlu1 %1706 }
  0xbb   : > { %v5983_v5 = vpop.permute.xlu0 %1701 }
  0xbf   : > { %v5996_v18 = vpop.permute.xlu0 %1711 }
  0xe7   : > { %v4907_v48 = vpop.f32.mrb[0].mxu0 }
  0xe8   : > { %v4923_v49 = vpop.f32.mrb[0].mxu1  ;;  %v634_v52 = vpop.f32.mrb[1].mxu0 }
  0xe9   : > { %v843_v51 = vadd.f32 %v4923_v49, %v5974_v47  ;;  %v837_v53 = vpop.f32.mrb[1].mxu1  ;;  %v635_v21 = vadd.f32 %v5974_v47, %v634_v52 }
  0xea   : > { %v838_v55 = vadd.f32 %v5974_v47, %v837_v53 }
  0xeb   : > { %v877_v56 = vmax.f32 %v843_v51, 0.0  ;;  %v4910_v58 = vpop.f32.mrb[2].mxu0 }
  0xec   : > { %v4926_v59 = vpop.f32.mrb[2].mxu1  ;;  %v876_v60 = vmax.f32 %v838_v55, 0.0  ;;  %v644_v62 = vpop.f32.mrb[3].mxu0  ;;  %v673_v55 = vmax.f32 %v635_v21, 0.0 }
  0xed   : > { %v853_v61 = vadd.f32 %v4926_v59, %v5974_v47  ;;  %v847_v63 = vpop.f32.mrb[3].mxu1  ;;  %v934_v1 = vmul.f32 %v901_v27, %v877_v56  ;;  %v645_v52 = vadd.f32 %v5974_v47, %v644_v62  ;;  %v6010_v59 = vpop.permute.xlu0 %1721 }
  0xee   : > { %v933_v6 = vmul.f32 %v896_v25, %v876_v60  ;;  %v848_v0 = vadd.f32 %v5974_v47, %v847_v63  ;;  %v6003_v25 = vpop.permute.xlu1 %1716  ;;  %v729_v62 = vmul.f32 %v5943_v33, %v673_v55 }
  0xef   : > { %v879_v2 = vmax.f32 %v853_v61, 0.0  ;;  %v4913_v3 = vpop.f32.mrb[4].mxu0 }
  0xf0   : > { %v4929_v4 = vpop.f32.mrb[4].mxu1  ;;  %v878_v8 = vmax.f32 %v848_v0, 0.0  ;;  %4935 = vmatprep.mubr.msk.f32.mxu0 %vm943_vm4, %v933_v6  ;;  %v654_v11 = vpop.f32.mrb[5].mxu0  ;;  %v675_v6 = vmax.f32 %v645_v52, 0.0 }
  0xf1   : > { %v863_v9 = vadd.f32 %v4929_v4, %v5974_v47  ;;  %v857_v12 = vpop.f32.mrb[5].mxu1  ;;  %4936 = vmatmul.mubr.msk.f32.vlgmr.msra.gmra.mrb[8].mxu0 %vm943_vm4, %v934_v1  ;;  %v936_v14 = vmul.f32 %v911_v28, %v879_v2  ;;  %v640_v28 = vadd.f32 %v4907_v48, %v5974_v47  ;;  %v650_v48 = vadd.f32 %v4910_v58, %v5974_v47  ;;  %v6023_v2 = vpop.permute.xlu0 %1731 }
  0xf2   : > { %v935_v13 = vmul.f32 %v906_v26, %v878_v8  ;;  %4948 = vmatpush3.msra.mxu0 %v5848_v57  ;;  %v858_v15 = vadd.f32 %v5974_v47, %v857_v12  ;;  %v6017_v63 = vpop.permute.xlu1 %1726  ;;  %v655_v0 = vadd.f32 %v5974_v47, %v654_v11  ;;  %v660_v4 = vadd.f32 %v4913_v3, %v5974_v47  ;;  %v4479_v11 = vld [vmem:[%s6411_s4 + $0x18] sm:$0xff] }
  0xf3   : > { %v4916_v16 = vpop.f32.mrb[6].mxu0  ;;  %4977 = vmatprep.subr.mxu0 %v4445_v10  ;;  %v881_v19 = vmax.f32 %v863_v9, 0.0  ;;  %v674_v61 = vmax.f32 %v640_v28, 0.0  ;;  %v731_v8 = vmul.f32 %v5947_v35, %v675_v6  ;;  %v4513_v6 = vld [vmem:[%s6411_s4 + $0x20] sm:$0xff] }
  0xf4   : > { %v4932_v17 = vpop.f32.mrb[6].mxu1  ;;  %4938 = vmatprep.mubr.msk.f32.mxu0 %vm943_vm4, %v935_v13  ;;  %v880_v22 = vmax.f32 %v858_v15, 0.0  ;;  %v664_v23 = vpop.f32.mrb[7].mxu0  ;;  %v677_v9 = vmax.f32 %v655_v0, 0.0  ;;  %v670_v35 = vadd.f32 %v4916_v16, %v5974_v47 }
  0xf5   : > { %v873_v20 = vadd.f32 %v4932_v17, %v5974_v47  ;;  %v867_v24 = vpop.f32.mrb[7].mxu1  ;;  %4939 = vmatmul.mubr.msk.f32.gmra.mrb[10].mxu0 %vm943_vm4, %v936_v14  ;;  %v938_v49 = vmul.f32 %v5937_v30, %v881_v19  ;;  %v730_v58 = vmul.f32 %v5945_v34, %v674_v61  ;;  %v665_v33 = vadd.f32 %v5974_v47, %v664_v23  ;;  %v6040_v21 = vpop.permute.xlu0 %2043 }
  0xf6   : > { %v868_v57 = vadd.f32 %v5974_v47, %v867_v24  ;;  %v937_v26 = vmul.f32 %v5935_v29, %v880_v22  ;;  %v6033_v13 = vpop.permute.xlu1 %1736  ;;  %v678_v14 = vmax.f32 %v660_v4, 0.0  ;;  %v733_v15 = vmul.f32 %v5951_v37, %v677_v9 }
  0xf7   : > { %v883_v51 = vmax.f32 %v873_v20, 0.0  ;;  %v679_v17 = vmax.f32 %v665_v33, 0.0 }
  0xf8   : > { %v4967_v27 = vpop.f32.mrb[8].mxu1  ;;  %v882_v53 = vmax.f32 %v868_v57, 0.0  ;;  %4941 = vmatprep.mubr.msk.f32.mxu0 %vm943_vm4, %v937_v26  ;;  %v734_v22 = vmul.f32 %v5953_v38, %v678_v14 }
  0xf9   : > { %v1301_v56 = vpop.f32.mrb[9].mxu1  ;;  %4942 = vmatmul.mubr.msk.f32.gmra.mrb[12].mxu0 %vm943_vm4, %v938_v49  ;;  %v940_v30 = vmul.f32 %v5941_v32, %v883_v51  ;;  %v676_v32 = vmax.f32 %v650_v48, 0.0  ;;  %v1307_v23 = vadd.f32 %v4967_v27, %v5974_v47  ;;  %v735_v37 = vmul.f32 %v5955_v39, %v679_v17  ;;  %v6052_v49 = vpop.permute.xlu0 %2053 }
  0xfa   : > { %v939_v60 = vmul.f32 %v5939_v31, %v882_v53  ;;  %v1302_v19 = vadd.f32 %v5974_v47, %v1301_v56  ;;  %v6046_v16 = vpop.permute.xlu1 %2048 }
  0xfb   : > { %v732_v3 = vmul.f32 %v5949_v36, %v676_v32  ;;  %v680_v36 = vmax.f32 %v670_v35, 0.0  ;;  %v1341_v51 = vmax.f32 %v1307_v23, 0.0 }
  0xfc   : > { %v4970_v29 = vpop.f32.mrb[10].mxu1  ;;  %4944 = vmatprep.mubr.msk.f32.mxu0 %vm943_vm4, %v939_v60  ;;  %v1340_v24 = vmax.f32 %v1302_v19, 0.0 }
  0xfd   : > { %v1311_v1 = vpop.f32.mrb[11].mxu1  ;;  %4945 = vmatmul.mubr.msk.f32.gmra.mrb[14].mxu0 %vm943_vm4, %v940_v30  ;;  %v736_v38 = vmul.f32 %v5957_v40, %v680_v36  ;;  %v1317_v27 = vadd.f32 %v4970_v29, %v5974_v47  ;;  %v1398_v61 = vmul.f32 %v5961_v42, %v1341_v51  ;;  %v6069_v0 = vpop.permute.xlu0 %2063 }
  0xfe   : > { %4949 = vmatprep.mubr.msk.f32.mxu0 %vm943_vm4, %v729_v62  ;;  %v1312_v57 = vadd.f32 %v5974_v47, %v1311_v1  ;;  %v1397_v53 = vmul.f32 %v5959_v41, %v1340_v24  ;;  %v6059_v56 = vpop.permute.xlu1 %2058 }
  0xff   : > { %v1343_v48 = vmax.f32 %v1317_v27, 0.0  ;;  %v4547_v27 = vld [vmem:[%s6411_s4 + $0x28] sm:$0xff] }
 0x100   : > { %v4973_v31 = vpop.f32.mrb[12].mxu1  ;;  %v1342_v55 = vmax.f32 %v1312_v57, 0.0 }
 0x101   : > { %v1321_v12 = vpop.f32.mrb[13].mxu1  ;;  %4950 = vmatmul.mubr.msk.f32.vlgmr.msra.gmra.mrb[8].mxu0 %vm943_vm4, %v730_v58  ;;  %v1327_v40 = vadd.f32 %v4973_v31, %v5974_v47  ;;  %v1400_v1 = vmul.f32 %v5965_v44, %v1343_v48 }
 0x102   : > { %4978 = vmatpush3.msra.mxu0 %v4445_v10  ;;  %4952 = vmatprep.mubr.msk.f32.mxu0 %vm943_vm4, %v731_v8  ;;  %v1322_v39 = vadd.f32 %v5974_v47, %v1321_v12  ;;  %v1399_v29 = vmul.f32 %v5963_v43, %v1342_v55  ;;  %v6075_v58 = vpop.permute.xlu1 %2068  ;;  %v6081_v12 = vpop.permute.xlu0 %2073 }
 0x103   : > { %5007 = vmatprep.subr.mxu0 %v4479_v11  ;;  %v1345_v31 = vmax.f32 %v1327_v40, 0.0 }
 0x104   : > { %v4976_v34 = vpop.f32.mrb[14].mxu1  ;;  %v1344_v30 = vmax.f32 %v1322_v39, 0.0 }
 0x105   : > { %v1331_v20 = vpop.f32.mrb[15].mxu1  ;;  %4953 = vmatmul.mubr.msk.f32.gmra.mrb[10].mxu0 %vm943_vm4, %v732_v3  ;;  %v1337_v43 = vadd.f32 %v4976_v34, %v5974_v47  ;;  %v1402_v44 = vmul.f32 %v5969_v46, %v1345_v31 }
 0x106   : > { %4955 = vmatprep.mubr.msk.f32.mxu0 %vm943_vm4, %v733_v15  ;;  %v1332_v41 = vadd.f32 %v5974_v47, %v1331_v20  ;;  %v1401_v32 = vmul.f32 %v5967_v45, %v1344_v30  ;;  %v6088_v15 = vpop.permute.xlu1 %2078  ;;  %v6095_v23 = vpop.permute.xlu0 %2385 }
 0x108   : > { %v4997_v10 = vpop.f32.mrb[16].mxu1  ;;  %v1346_v4 = vmax.f32 %v1332_v41, 0.0 }
 0x109   : > { %v1643_v26 = vpop.f32.mrb[17].mxu1  ;;  %4956 = vmatmul.mubr.msk.f32.gmra.mrb[12].mxu0 %vm943_vm4, %v734_v22  ;;  %v1649_v34 = vadd.f32 %v4997_v10, %v5974_v47 }
 0x10a   : > { %4958 = vmatprep.mubr.msk.f32.mxu0 %vm943_vm4, %v735_v37  ;;  %v1644_v8 = vadd.f32 %v5974_v47, %v1643_v26  ;;  %v1403_v3 = vmul.f32 %v5976_v50, %v1346_v4 }
 0x10b   : > { %v1683_v20 = vmax.f32 %v1649_v34, 0.0 }
 0x10c   : > { %v5000_v28 = vpop.f32.mrb[18].mxu1  ;;  %v1682_v14 = vmax.f32 %v1644_v8, 0.0 }
 0x10d   : > { %v1653_v52 = vpop.f32.mrb[19].mxu1  ;;  %4959 = vmatmul.mubr.msk.f32.gmra.mrb[14].mxu0 %vm943_vm4, %v736_v38  ;;  %v1659_v46 = vadd.f32 %v5000_v28, %v5974_v47  ;;  %v1740_v24 = vmul.f32 %v5986_v7, %v1683_v20  ;;  %v6101_v28 = vpop.permute.xlu1 %2390 }
 0x10e   : > { %4979 = vmatprep.mubr.msk.f32.mxu0 %vm943_vm4, %v1397_v53  ;;  %v1654_v45 = vadd.f32 %v5974_v47, %v1653_v52  ;;  %v1739_v10 = vmul.f32 %v5983_v5, %v1682_v14  ;;  %v6110_v53 = vpop.permute.xlu0 %2395 }
 0x10f   : > { %v1685_v57 = vmax.f32 %v1659_v46, 0.0 }
 0x110   : > { %v5003_v60 = vpop.f32.mrb[20].mxu1  ;;  %v1684_v50 = vmax.f32 %v1654_v45, 0.0 }
 0x111   : > { %v1663_v62 = vpop.f32.mrb[21].mxu1  ;;  %4980 = vmatmul.mubr.msk.f32.vlgmr.msra.gmra.mrb[8].mxu0 %vm943_vm4, %v1398_v61  ;;  %v1742_v55 = vmul.f32 %v6003_v25, %v1685_v57  ;;  %v6117_v40 = vpop.permute.xlu1 %2400 }
 0x112   : > { %5008 = vmatpush3.msra.mxu0 %v4479_v11  ;;  %4982 = vmatprep.mubr.msk.f32.mxu0 %vm943_vm4, %v1399_v29  ;;  %v1347_v11 = vmax.f32 %v1337_v43, 0.0  ;;  %v1664_v36 = vadd.f32 %v5974_v47, %v1663_v62  ;;  %v1741_v5 = vmul.f32 %v5996_v18, %v1684_v50 }
 0x113   : > { %5037 = vmatprep.subr.mxu0 %v4513_v6 }
 0x114   : > { %v5006_v42 = vpop.f32.mrb[22].mxu1  ;;  %v1404_v19 = vmul.f32 %v5979_v54, %v1347_v11  ;;  %v1669_v54 = vadd.f32 %v5003_v60, %v5974_v47  ;;  %v1686_v38 = vmax.f32 %v1664_v36, 0.0 }
 0x115   : > { %v1673_v9 = vpop.f32.mrb[23].mxu1  ;;  %4983 = vmatmul.mubr.msk.f32.gmra.mrb[10].mxu0 %vm943_vm4, %v1400_v1  ;;  %v1679_v18 = vadd.f32 %v5006_v42, %v5974_v47  ;;  %v6124_v1 = vpop.permute.xlu0 %2405 }
 0x116   : > { %4985 = vmatprep.mubr.msk.f32.mxu0 %vm943_vm4, %v1401_v32  ;;  %v1674_v51 = vadd.f32 %v5974_v47, %v1673_v9  ;;  %v1687_v39 = vmax.f32 %v1669_v54, 0.0  ;;  %v1743_v60 = vmul.f32 %v6010_v59, %v1686_v38  ;;  %v6130_v8 = vpop.permute.xlu1 %2410 }
 0x117   : > { %v1689_v25 = vmax.f32 %v1679_v18, 0.0 }
 0x118   : > { %v5027_v33 = vpop.f32.mrb[24].mxu1  ;;  %v1688_v61 = vmax.f32 %v1674_v51, 0.0  ;;  %v1744_v30 = vmul.f32 %v6017_v63, %v1687_v39 }
 0x119   : > { %v1985_v35 = vpop.f32.mrb[25].mxu1  ;;  %4986 = vmatmul.mubr.msk.f32.gmra.mrb[12].mxu0 %vm943_vm4, %v1402_v44  ;;  %v1991_v41 = vadd.f32 %v5027_v33, %v5974_v47  ;;  %v1746_v43 = vmul.f32 %v6033_v13, %v1689_v25  ;;  %v6136_v11 = vpop.permute.xlu0 %2415 }
 0x11a   : > { %4988 = vmatprep.mubr.msk.f32.mxu0 %vm943_vm4, %v1403_v3  ;;  %v1986_v48 = vadd.f32 %v5974_v47, %v1985_v35 }
 0x11b   : > { %v2025_v32 = vmax.f32 %v1991_v41, 0.0 }
 0x11c   : > { %v5030_v17 = vpop.f32.mrb[26].mxu1  ;;  %v2024_v42 = vmax.f32 %v1986_v48, 0.0 }
 0x11d   : > { %v1995_v22 = vpop.f32.mrb[27].mxu1  ;;  %4989 = vmatmul.mubr.msk.f32.gmra.mrb[14].mxu0 %vm943_vm4, %v1404_v19  ;;  %v2001_v63 = vadd.f32 %v5030_v17, %v5974_v47  ;;  %v2082_v13 = vmul.f32 %v6046_v16, %v2025_v32  ;;  %v4581_v17 = vld [vmem:[%s6411_s4 + $0x30] sm:$0xff]  ;;  %v6146_v19 = vpop.permute.xlu1 %2420 }
 0x11e   : > { %5009 = vmatprep.mubr.msk.f32.mxu0 %vm943_vm4, %v1739_v10  ;;  %v1996_v59 = vadd.f32 %v5974_v47, %v1995_v22 }
 0x11f   : > { %v2027_v34 = vmax.f32 %v2001_v63, 0.0 }
 0x120   : > { %v5033_v37 = vpop.f32.mrb[28].mxu1  ;;  %v2026_v9 = vmax.f32 %v1996_v59, 0.0 }
 0x121   : > { %v2005_v26 = vpop.f32.mrb[29].mxu1  ;;  %5010 = vmatmul.mubr.msk.f32.vlgmr.msra.gmra.mrb[8].mxu0 %vm943_vm4, %v1740_v24  ;;  %v2011_v3 = vadd.f32 %v5033_v37, %v5974_v47  ;;  %v2084_v20 = vmul.f32 %v6059_v56, %v2027_v34  ;;  %v6153_v37 = vpop.permute.xlu0 %2727 }
 0x122   : > { %5038 = vmatpush3.msra.mxu0 %v4513_v6  ;;  %5012 = vmatprep.mubr.msk.f32.mxu0 %vm943_vm4, %v1741_v5  ;;  %v1745_v6 = vmul.f32 %v6023_v2, %v1688_v61  ;;  %v2081_v2 = vmul.f32 %v6040_v21, %v2024_v42  ;;  %v2006_v33 = vadd.f32 %v5974_v47, %v2005_v26  ;;  %v6159_v5 = vpop.permute.xlu1 %2732 }
 0x123   : > { %5067 = vmatprep.subr.mxu0 %v4547_v27  ;;  %v2083_v45 = vmul.f32 %v6052_v49, %v2026_v9  ;;  %v2029_v46 = vmax.f32 %v2011_v3, 0.0 }
 0x124   : > { %v5036_v7 = vpop.f32.mrb[30].mxu1  ;;  %v2028_v35 = vmax.f32 %v2006_v33, 0.0 }
 0x125   : > { %v2015_v52 = vpop.f32.mrb[31].mxu1  ;;  %5013 = vmatmul.mubr.msk.f32.gmra.mrb[10].mxu0 %vm943_vm4, %v1742_v55  ;;  %v2021_v49 = vadd.f32 %v5036_v7, %v5974_v47  ;;  %v2086_v57 = vmul.f32 %v6075_v58, %v2029_v46  ;;  %v6165_v7 = vpop.permute.xlu0 %2737 }
 0x126   : > { %5015 = vmatprep.mubr.msk.f32.mxu0 %vm943_vm4, %v1743_v60  ;;  %v2016_v21 = vadd.f32 %v5974_v47, %v2015_v52  ;;  %v2085_v10 = vmul.f32 %v6069_v0, %v2028_v35  ;;  %v6172_v61 = vpop.permute.xlu1 %2742 }
 0x127   : > { %v2031_v56 = vmax.f32 %v2021_v49, 0.0 }
 0x128   : > { %v5057_v29 = vpop.f32.mrb[32].mxu1  ;;  %v2030_v50 = vmax.f32 %v2016_v21, 0.0 }
 0x129   : > { %v2327_v62 = vpop.f32.mrb[33].mxu1  ;;  %5016 = vmatmul.mubr.msk.f32.gmra.mrb[12].mxu0 %vm943_vm4, %v1744_v30  ;;  %v2333_v54 = vadd.f32 %v5057_v29, %v5974_v47  ;;  %v2088_v58 = vmul.f32 %v6088_v15, %v2031_v56  ;;  %v2748_v42 = vpop.permute.xlu0 %2747 }
 0x12a   : > { %5018 = vmatprep.mubr.msk.f32.mxu0 %vm943_vm4, %v1745_v6  ;;  %v2328_v36 = vadd.f32 %v5974_v47, %v2327_v62  ;;  %v2087_v0 = vmul.f32 %v6081_v12, %v2030_v50  ;;  %v4615_v6 = vld [vmem:[%s6411_s4 + $0x38] sm:$0xff]  ;;  %v2753_v32 = vpop.permute.xlu1 %2752 }
 0x12b   : > { %v2367_v55 = vmax.f32 %v2333_v54, 0.0  ;;  %v4649_v54 = vld [vmem:[%s6411_s4 + $0x40] sm:$0xff] }
 0x12c   : > { %v5060_v31 = vpop.f32.mrb[34].mxu1  ;;  %v2366_v38 = vmax.f32 %v2328_v36, 0.0 }
 0x12d   : > { %v2337_v4 = vpop.f32.mrb[35].mxu1  ;;  %5019 = vmatmul.mubr.msk.f32.gmra.mrb[14].mxu0 %vm943_vm4, %v1746_v43  ;;  %v2343_v39 = vadd.f32 %v5060_v31, %v5974_v47  ;;  %v2424_v29 = vmul.f32 %v6101_v28, %v2367_v55  ;;  %v2758_v33 = vpop.permute.xlu0 %2757 }
 0x12e   : > { %5039 = vmatprep.mubr.msk.f32.mxu0 %vm943_vm4, %v2081_v2  ;;  %v2338_v51 = vadd.f32 %v5974_v47, %v2337_v4  ;;  %v2423_v52 = vmul.f32 %v6095_v23, %v2366_v38 }
 0x12f   : > { %v2369_v30 = vmax.f32 %v2343_v39, 0.0 }
 0x130   : > { %v5063_v44 = vpop.f32.mrb[36].mxu1  ;;  %v2368_v60 = vmax.f32 %v2338_v51, 0.0 }
 0x131   : > { %v2347_v14 = vpop.f32.mrb[37].mxu1  ;;  %5040 = vmatmul.mubr.msk.f32.vlgmr.msra.gmra.mrb[8].mxu0 %vm943_vm4, %v2082_v13  ;;  %v2353_v15 = vadd.f32 %v5063_v44, %v5974_v47  ;;  %v2426_v59 = vmul.f32 %v6117_v40, %v2369_v30  ;;  %v3070_v49 = vpop.permute.xlu0 %3069 }
 0x132   : > { %5068 = vmatpush3.msra.mxu0 %v4547_v27  ;;  %5042 = vmatprep.mubr.msk.f32.mxu0 %vm943_vm4, %v2083_v45  ;;  %v2348_v12 = vadd.f32 %v5974_v47, %v2347_v14  ;;  %v2425_v41 = vmul.f32 %v6110_v53, %v2368_v60  ;;  %v2763_v45 = vpop.permute.xlu1 %2762 }
 0x133   : > { %5097 = vmatprep.subr.mxu0 %v4581_v17  ;;  %v2371_v31 = vmax.f32 %v2353_v15, 0.0 }
 0x134   : > { %v5066_v16 = vpop.f32.mrb[38].mxu1  ;;  %v2370_v62 = vmax.f32 %v2348_v12, 0.0 }
 0x135   : > { %v2357_v22 = vpop.f32.mrb[39].mxu1  ;;  %5043 = vmatmul.mubr.msk.f32.gmra.mrb[10].mxu0 %vm943_vm4, %v2084_v20  ;;  %v2363_v43 = vadd.f32 %v5066_v16, %v5974_v47  ;;  %v2428_v44 = vmul.f32 %v6130_v8, %v2371_v31 }
 0x136   : > { %5045 = vmatprep.mubr.msk.f32.mxu0 %vm943_vm4, %v2085_v10  ;;  %v2358_v23 = vadd.f32 %v5974_v47, %v2357_v22  ;;  %v2427_v63 = vmul.f32 %v6124_v1, %v2370_v62 }
 0x137   : > { %v2373_v40 = vmax.f32 %v2363_v43, 0.0 }
 0x138   : > { %v5087_v24 = vpop.f32.mrb[40].mxu1  ;;  %v2372_v4 = vmax.f32 %v2358_v23, 0.0 }
 0x139   : > { %v2669_v26 = vpop.f32.mrb[41].mxu1  ;;  %5046 = vmatmul.mubr.msk.f32.gmra.mrb[12].mxu0 %vm943_vm4, %v2086_v57  ;;  %v2675_v13 = vadd.f32 %v5087_v24, %v5974_v47  ;;  %v2430_v21 = vmul.f32 %v6146_v19, %v2373_v40  ;;  %v3075_v24 = vpop.permute.xlu1 %3074 }
 0x13a   : > { %5048 = vmatprep.mubr.msk.f32.mxu0 %vm943_vm4, %v2087_v0  ;;  %v2670_v2 = vadd.f32 %v5974_v47, %v2669_v26  ;;  %v2429_v3 = vmul.f32 %v6136_v11, %v2372_v4 }
 0x13c   : > { %v5090_v27 = vpop.f32.mrb[42].mxu1  ;;  %v2708_v14 = vmax.f32 %v2670_v2, 0.0 }
 0x13d   : > { %v2679_v18 = vpop.f32.mrb[43].mxu1  ;;  %5049 = vmatmul.mubr.msk.f32.gmra.mrb[14].mxu0 %vm943_vm4, %v2088_v58  ;;  %v2685_v8 = vadd.f32 %v5090_v27, %v5974_v47  ;;  %v3085_v39 = vpop.permute.xlu1 %3084 }
 0x13e   : > { %5069 = vmatprep.mubr.msk.f32.mxu0 %vm943_vm4, %v2423_v52  ;;  %v2680_v1 = vadd.f32 %v5974_v47, %v2679_v18  ;;  %v2765_v20 = vmul.f32 %v6153_v37, %v2708_v14 }
 0x13f   : > { %v2711_v50 = vmax.f32 %v2685_v8, 0.0 }
 0x140   : > { %v5093_v48 = vpop.f32.mrb[44].mxu1  ;;  %v2710_v46 = vmax.f32 %v2680_v1, 0.0 }
 0x141   : > { %v2689_v25 = vpop.f32.mrb[45].mxu1  ;;  %5070 = vmatmul.mubr.msk.f32.vlgmr.msra.gmra.mrb[8].mxu0 %vm943_vm4, %v2424_v29  ;;  %v2695_v19 = vadd.f32 %v5093_v48, %v5974_v47  ;;  %v2768_v0 = vmul.f32 %v6172_v61, %v2711_v50 }
 0x142   : > { %5098 = vmatpush3.msra.mxu0 %v4581_v17  ;;  %5072 = vmatprep.mubr.msk.f32.mxu0 %vm943_vm4, %v2425_v41  ;;  %v2709_v17 = vmax.f32 %v2675_v13, 0.0  ;;  %v2690_v11 = vadd.f32 %v5974_v47, %v2689_v25  ;;  %v2767_v57 = vmul.f32 %v6165_v7, %v2710_v46 }
 0x143   : > { %5127 = vmatprep.subr.mxu0 %v4615_v6  ;;  %v2713_v38 = vmax.f32 %v2695_v19, 0.0 }
 0x144   : > { %v5096_v28 = vpop.f32.mrb[46].mxu1  ;;  %v2766_v10 = vmul.f32 %v6159_v5, %v2709_v17  ;;  %v2712_v56 = vmax.f32 %v2690_v11, 0.0  ;;  %v3080_v5 = vpop.permute.xlu0 %3079 }
 0x145   : > { %v2699_v53 = vpop.f32.mrb[47].mxu1  ;;  %5073 = vmatmul.mubr.msk.f32.gmra.mrb[10].mxu0 %vm943_vm4, %v2426_v59  ;;  %v2705_v51 = vadd.f32 %v5096_v28, %v5974_v47  ;;  %v2770_v52 = vmul.f32 %v2753_v32, %v2713_v38 }
 0x146   : > { %5075 = vmatprep.mubr.msk.f32.mxu0 %vm943_vm4, %v2427_v63  ;;  %v2700_v37 = vadd.f32 %v5974_v47, %v2699_v53  ;;  %v2769_v7 = vmul.f32 %v2748_v42, %v2712_v56  ;;  %v3095_v42 = vpop.permute.xlu1 %3094 }
 0x147   : > { %v2715_v60 = vmax.f32 %v2705_v51, 0.0 }
 0x148   : > { %v5117_v9 = vpop.f32.mrb[48].mxu1  ;;  %v2714_v58 = vmax.f32 %v2700_v37, 0.0  ;;  %v3090_v15 = vpop.permute.xlu0 %3089 }
 0x149   : > { %v3011_v34 = vpop.f32.mrb[49].mxu1  ;;  %5076 = vmatmul.mubr.msk.f32.gmra.mrb[12].mxu0 %vm943_vm4, %v2428_v44  ;;  %v3017_v12 = vadd.f32 %v5117_v9, %v5974_v47  ;;  %v2772_v41 = vmul.f32 %v2763_v45, %v2715_v60 }
 0x14a   : > { %5078 = vmatprep.mubr.msk.f32.mxu0 %vm943_vm4, %v2429_v3  ;;  %v3012_v55 = vadd.f32 %v5974_v47, %v3011_v34  ;;  %v2771_v48 = vmul.f32 %v2758_v33, %v2714_v58  ;;  %v3105_v40 = vpop.permute.xlu1 %3104 }
 0x14b   : > { %v3051_v62 = vmax.f32 %v3017_v12, 0.0 }
 0x14c   : > { %v5120_v35 = vpop.f32.mrb[50].mxu1  ;;  %v3050_v29 = vmax.f32 %v3012_v55, 0.0  ;;  %v3100_v53 = vpop.permute.xlu0 %3099 }
 0x14d   : > { %v3021_v16 = vpop.f32.mrb[51].mxu1  ;;  %5079 = vmatmul.mubr.msk.f32.gmra.mrb[14].mxu0 %vm943_vm4, %v2430_v21  ;;  %v3027_v23 = vadd.f32 %v5120_v35, %v5974_v47  ;;  %v3108_v32 = vmul.f32 %v3075_v24, %v3051_v62  ;;  %v5398_v62 = vmov 0.0  }
 0x14e   : > { %5099 = vmatprep.mubr.msk.f32.mxu0 %vm943_vm4, %v2765_v20  ;;  %v3022_v30 = vadd.f32 %v5974_v47, %v3021_v16  ;;  %v3107_v28 = vmul.f32 %v3070_v49, %v3050_v29  ;;  %v3417_v46 = vpop.permute.xlu1 %3416  ;;  %5175 = vmatprep.mubr.msk.f32.mxu1 %vm5397_vm5, %v5398_v62 }
 0x14f   : > { %v3053_v63 = vmax.f32 %v3027_v23, 0.0  ;;  %v4658_v23 = vld [vmem:[%s6412_s5] ss:$0 sm:$0xff] }
 0x150   : > { %v5123_v22 = vpop.f32.mrb[52].mxu1  ;;  %v3052_v59 = vmax.f32 %v3022_v30, 0.0  ;;  %v3412_v17 = vpop.permute.xlu0 %3411 }
 0x151   : > { %v3031_v36 = vpop.f32.mrb[53].mxu1  ;;  %5100 = vmatmul.mubr.msk.f32.vlgmr.msra.gmra.mrb[8].mxu0 %vm943_vm4, %v2766_v10  ;;  %v3037_v4 = vadd.f32 %v5123_v22, %v5974_v47  ;;  %v3110_v34 = vmul.f32 %v3085_v39, %v3053_v63 }
 0x152   : > { %5128 = vmatpush3.msra.mxu0 %v4615_v6  ;;  %5102 = vmatprep.mubr.msk.f32.mxu0 %vm943_vm4, %v2767_v57  ;;  %v3032_v31 = vadd.f32 %v5974_v47, %v3031_v36  ;;  %v3109_v9 = vmul.f32 %v3080_v5, %v3052_v59  ;;  %v3427_v37 = vpop.permute.xlu1 %3426 }
 0x153   : > { %5157 = vmatprep.subr.mxu0 %v4649_v54  ;;  %v3055_v3 = vmax.f32 %v3037_v4, 0.0 }
 0x154   : > { %v5126_v26 = vpop.f32.mrb[54].mxu1  ;;  %v3054_v33 = vmax.f32 %v3032_v31, 0.0  ;;  %v3422_v10 = vpop.permute.xlu0 %3421 }
 0x155   : > { %v3041_v27 = vpop.f32.mrb[55].mxu1  ;;  %5103 = vmatmul.mubr.msk.f32.gmra.mrb[10].mxu0 %vm943_vm4, %v2768_v0  ;;  %v3047_v14 = vadd.f32 %v5126_v26, %v5974_v47  ;;  %v3112_v8 = vmul.f32 %v3095_v42, %v3055_v3 }
 0x156   : > { %5105 = vmatprep.mubr.msk.f32.mxu0 %vm943_vm4, %v2769_v7  ;;  %v3042_v44 = vadd.f32 %v5974_v47, %v3041_v27  ;;  %v3111_v45 = vmul.f32 %v3090_v15, %v3054_v33  ;;  %v3437_v39 = vpop.permute.xlu1 %3436  ;;  %v3644_v15 = vld [vmem:[%s6413_s6 + $0x8] sm:$0xff] }
 0x157   : > { %v3057_v16 = vmax.f32 %v3047_v14, 0.0 }
 0x158   : > { %v5147_v18 = vpop.f32.mrb[56].mxu1  ;;  %v3056_v35 = vmax.f32 %v3042_v44, 0.0  ;;  %v3432_v27 = vpop.permute.xlu0 %3431 }
 0x159   : > { %v3353_v61 = vpop.f32.mrb[57].mxu1  ;;  %5106 = vmatmul.mubr.msk.f32.gmra.mrb[12].mxu0 %vm943_vm4, %v2770_v52  ;;  %v3359_v20 = vadd.f32 %v5147_v18, %v5974_v47  ;;  %v3114_v50 = vmul.f32 %v3105_v40, %v3057_v16 }
 0x15a   : > { %5108 = vmatprep.mubr.msk.f32.mxu0 %vm943_vm4, %v2771_v48  ;;  %v3354_v21 = vadd.f32 %v5974_v47, %v3353_v61  ;;  %v3113_v11 = vmul.f32 %v3100_v53, %v3056_v35  ;;  %v3447_v29 = vpop.permute.xlu1 %3446 }
 0x15b   : > { %v3393_v19 = vmax.f32 %v3359_v20, 0.0 }
 0x15c   : > { %v5150_v25 = vpop.f32.mrb[58].mxu1  ;;  %v3392_v49 = vmax.f32 %v3354_v21, 0.0  ;;  %v3442_v60 = vpop.permute.xlu0 %3441 }
 0x15d   : > { %v3363_v6 = vpop.f32.mrb[59].mxu1  ;;  %5109 = vmatmul.mubr.msk.f32.gmra.mrb[14].mxu0 %vm943_vm4, %v2772_v41  ;;  %v3369_v36 = vadd.f32 %v5150_v25, %v5974_v47  ;;  %v5396_v41 = vmov 0.0|0.0  }
 0x15e   : > { %5129 = vmatprep.mubr.msk.f32.mxu0 %vm943_vm4, %v3107_v28  ;;  %v3364_v22 = vadd.f32 %v5974_v47, %v3363_v6  ;;  %v3449_v24 = vmul.f32 %v3412_v17, %v3392_v49  ;;  %5289 = vmatprep.subr.bf16.mxu1 %v5396_v41 }
 0x15f   : > { %v3395_v26 = vmax.f32 %v3369_v36, 0.0 }
 0x160   : > { %v5153_v43 = vpop.f32.mrb[60].mxu1  ;;  %v3394_v57 = vmax.f32 %v3364_v22, 0.0 }
 0x161   : > { %v3373_v2 = vpop.f32.mrb[61].mxu1  ;;  %5130 = vmatmul.mubr.msk.f32.vlgmr.msra.gmra.mrb[8].mxu0 %vm943_vm4, %v3108_v32  ;;  %v3379_v5 = vadd.f32 %v5153_v43, %v5974_v47  ;;  %v3452_v7 = vmul.f32 %v3427_v37, %v3395_v26 }
 0x162   : > { %5158 = vmatpush3.msra.mxu0 %v4649_v54  ;;  %5132 = vmatprep.mubr.msk.f32.mxu0 %vm943_vm4, %v3109_v9  ;;  %v3374_v56 = vadd.f32 %v5974_v47, %v3373_v2  ;;  %v3450_v54 = vmul.f32 %v3417_v46, %v3393_v19  ;;  %v3451_v0 = vmul.f32 %v3422_v10, %v3394_v57 }
 0x163   : > { %v3397_v58 = vmax.f32 %v3379_v5, 0.0 }
 0x164   : > { %v5156_v13 = vpop.f32.mrb[62].mxu1  ;;  %v3396_v38 = vmax.f32 %v3374_v56, 0.0 }
 0x165   : > { %v3383_v1 = vpop.f32.mrb[63].mxu1  ;;  %5133 = vmatmul.mubr.msk.f32.gmra.mrb[10].mxu0 %vm943_vm4, %v3110_v34  ;;  %v3389_v55 = vadd.f32 %v5156_v13, %v5974_v47  ;;  %v3454_v12 = vmul.f32 %v3437_v39, %v3397_v58  ;;  %v3727_v39 = vld [vmem:[%s6417_s10 + $0x10] sm:$0xff] }
 0x166   : > { %5135 = vmatprep.mubr.msk.f32.mxu0 %vm943_vm4, %v3111_v45  ;;  %v3384_v51 = vadd.f32 %v5974_v47, %v3383_v1  ;;  %v3453_v18 = vmul.f32 %v3432_v27, %v3396_v38  ;;  %v3643_v47 = vld [vmem:[%s6413_s6] sm:$0xff]  ;;  %v3726_v27 = vld [vmem:[%s6417_s10 + $0x8] sm:$0xff] }
 0x167   : > { %v3399_v61 = vmax.f32 %v3389_v55, 0.0  ;;  %v5290_v25 = vpack.c.bf16 %v3644_v15, %v3643_v47  ;;  %v6300_v15 = vld [vmem:[%s6415_s8] sm:$0xff] }
 0x168   : > { %v3398_v52 = vmax.f32 %v3384_v51, 0.0  ;;  %v3725_v51 = vld [vmem:[%s6417_s10] sm:$0xff] }
 0x169   : > { %5136 = vmatmul.mubr.msk.f32.gmra.mrb[12].mxu0 %vm943_vm4, %v3112_v8  ;;  %v3456_v30 = vmul.f32 %v3447_v29, %v3399_v61  ;;  %5291 = vmatpush3.bf16.msra.mxu1 %v5290_v25  ;;  %v5293_v58 = vpack.c.bf16 %v3726_v27, %v3725_v51  ;;  %v3989_v61 = vld [vmem:[%s6419_s12] sm:$0xff] }
 0x16a   : > { %5138 = vmatprep.mubr.msk.f32.mxu0 %vm943_vm4, %v3113_v11  ;;  %v3455_v48 = vmul.f32 %v3442_v60, %v3398_v52  ;;  %5292 = vmatprep.subr.bf16.mxu1 %v5396_v41  ;;  %v3811_v60 = vld [vmem:[%s6416_s9] sm:$0x7] }
 0x16d   : > { %5139 = vmatmul.mubr.msk.f32.gmra.mrb[14].mxu0 %vm943_vm4, %v3114_v50 }
 0x16e   : > { %5159 = vmatprep.mubr.msk.f32.mxu0 %vm943_vm4, %v3449_v24 }
 0x171   : > { %5160 = vmatmul.mubr.msk.f32.vlgmr.msra.gmra.mrb[8].mxu0 %vm943_vm4, %v3450_v54 }
 0x172   : > { %5162 = vmatprep.mubr.msk.f32.mxu0 %vm943_vm4, %v3451_v0 }
 0x175   : > { %5163 = vmatmul.mubr.msk.f32.gmra.mrb[10].mxu0 %vm943_vm4, %v3452_v7 }
 0x176   : > { %5165 = vmatprep.mubr.msk.f32.mxu0 %vm943_vm4, %v3453_v18  ;;  %v3728_v18 = vld [vmem:[%s6417_s10 + $0x18] sm:$0xff] }
 0x177   : > { %v5296_v52 = vpack.c.bf16 %v3728_v18, %v3727_v39 }
 0x179   : > { %5166 = vmatmul.mubr.msk.f32.gmra.mrb[12].mxu0 %vm943_vm4, %v3454_v12  ;;  %v4659_v12 = vld [vmem:[%s6414_s7] ss:$0 sm:$0xff] }
 0x17a   : > { %5168 = vmatprep.mubr.msk.f32.mxu0 %vm943_vm4, %v3455_v48  ;;  %v3990_v48 = vld [vmem:[%s6419_s12 + $0x8] sm:$0xff] }
 0x17b   : > { %v5298_v25 = vpack.c.bf16 %v3990_v48, %v3989_v61  ;;  %v4672_v61 = vld [vmem:[%s6420_s13] ss:$0 sm:$0xff] }
 0x17d   : > { %5169 = vmatmul.mubr.msk.f32.gmra.mrb[14].mxu0 %vm943_vm4, %v3456_v30 }
 0x244   : > { %v5161_v6 = vpop.f32.mrb[8].mxu0 }
 0x245   : > { %v3604_v42 = vadd.f32 %v5161_v6, %v4658_v23  ;;  %v3549_v28 = vpop.f32.mrb[9].mxu0  ;;  %v6326_v6 = vld [vmem:[%s6415_s8 + $0x20] sm:$0xff] }
 0x246   : > { %v3603_v59 = vadd.f32 %v4658_v23, %v3549_v28  ;;  %v6340_v28 = vld [vmem:[%s6415_s8 + $0x30] sm:$0xff] }
 0x247   : > { %v3612_v31 = vmax.f32 %v3604_v42, 0.0  ;;  %v6335_v42 = vld [vmem:[%s6415_s8 + $0x28] sm:$0xff] }
 0x248   : > { %v3611_v43 = vmax.f32 %v3603_v59, 0.0  ;;  %v5164_v53 = vpop.f32.mrb[10].mxu0  ;;  %v6349_v59 = vld [vmem:[%s6415_s8 + $0x38] sm:$0xff] }
 0x249   : > { %v3621_v32 = vsel %vm3619_vm6, %v3612_v31, 0.0  ;;  %v3606_v63 = vadd.f32 %v5164_v53, %v4658_v23  ;;  %v3559_v4 = vpop.f32.mrb[11].mxu0  ;;  %v4151_v31 = vld [vmem:[%s6421_s14] sm:$0xff] }
 0x24a   : > { %v3620_v2 = vsel %vm3619_vm6, %v3611_v43, 0.0  ;;  %v3605_v9 = vadd.f32 %v4658_v23, %v3559_v4  ;;  %v4152_v43 = vld [vmem:[%s6421_s14 + $0x8] sm:$0xff] }
 0x24b   : > { %v3622_v33 = vadd.f32 %v3621_v32, %v3620_v2  ;;  %v3614_v44 = vmax.f32 %v3606_v63, 0.0  ;;  %v5302_v53 = vpack.c.bf16 %v4152_v43, %v4151_v31  ;;  %v3812_v32 = vlaneseq }
 0x24c   : > { %v3613_v40 = vmax.f32 %v3605_v9, 0.0  ;;  %v5167_v13 = vpop.f32.mrb[12].mxu0 }
 0x24d   : > { %v3608_v34 = vadd.f32 %v5167_v13, %v4658_v23  ;;  %v3569_v3 = vpop.f32.mrb[13].mxu0  ;;  %v3625_v35 = vsel %vm3619_vm6, %v3614_v44, 0.0  ;;  %5303 = vmatprep.subr.bf16.mxu0 %v5302_v53  ;;  %v3813_v63 = vshrl.u32 %v3812_v32, 7 }
 0x24e   : > { %v3623_v14 = vsel %vm3619_vm6, %v3613_v40, 0.0  ;;  %v3607_v1 = vadd.f32 %v4658_v23, %v3569_v3  ;;  %5305 = vmatpush3.bf16.msra.mxu0 %v5302_v53  ;;  %v4671_v40 = vld [vmem:[%s6418_s11] ss:$0 sm:$0xff] }
 0x24f   : > { %v3624_v45 = vadd.f32 %v3623_v14, %v3622_v33  ;;  %v3616_v21 = vmax.f32 %v3608_v34, 0.0  ;;  %v3814_v4 = vsub.s32 0, %v3813_v63 }
 0x250   : > { %v3615_v17 = vmax.f32 %v3607_v1, 0.0  ;;  %v5170_v8 = vpop.f32.mrb[14].mxu0 }
 0x251   : > { %v3626_v16 = vadd.f32 %v3625_v35, %v3624_v45  ;;  %v3610_v20 = vadd.f32 %v5170_v8, %v4658_v23  ;;  %v3579_v46 = vpop.f32.mrb[15].mxu0  ;;  %v3629_v10 = vsel %vm3619_vm6, %v3616_v21, 0.0 }
 0x252   : > { %v3627_v11 = vsel %vm3619_vm6, %v3615_v17, 0.0  ;;  %v3609_v49 = vadd.f32 %v4658_v23, %v3579_v46  ;;  %v6321_v23 = vld [vmem:[%s6415_s8 + $0x18] sm:$0xff] }
 0x253   : > { %v3628_v22 = vadd.f32 %v3627_v11, %v3626_v16  ;;  %v3618_v50 = vmax.f32 %v3610_v20, 0.0 }
 0x254   : > { %v3617_v19 = vmax.f32 %v3609_v49, 0.0 }
 0x255   : > { %v3630_v36 = vadd.f32 %v3629_v10, %v3628_v22  ;;  %v3633_v56 = vsel %vm3619_vm6, %v3618_v50, 0.0 }
 0x256   : > { %v3631_v24 = vsel %vm3619_vm6, %v3617_v19, 0.0 }
 0x257   : > { %v3632_v57 = vadd.f32 %v3631_v24, %v3630_v36 }
 0x259   : > { %v3634_v37 = vadd.f32 %v3633_v56, %v3632_v57 }
 0x25b   : > { %v3635_v54 = vrot.slane %v3634_v37, 4 }
 0x25d   : > { %v3636_v26 = vadd.f32 %v3635_v54, %v3634_v37 }
 0x25f   : > { %v3637_v5 = vrot.slane %v3636_v26, 2 }
 0x261   : > { %v3638_v0 = vadd.f32 %v3637_v5, %v3636_v26 }
 0x263   : > { %v3639_v38 = vrot.slane %v3638_v0, 1 }
 0x265   : > { %v3640_v7 = vadd.f32 %v3639_v38, %v3638_v0 }
 0x267   : > { %v3642_v55 = vmul.f32 0.015625, %v3640_v7 }
 0x269   : > { %5176 = vmatmul.mubr.msk.f32.vlgmr.msra.gmra.mrb[64].mxu1 %vm3619_vm6, %v3642_v55 }
 0x26a   : > { %5294 = vmatpush3.bf16.msra.mxu1 %v5293_v58  ;;  %5186 = vmatprep.mubr.msk.f32.mxu1 %vm5397_vm5, %v5398_v62  ;;  %v6312_v62 = vld [vmem:[%s6415_s8 + $0x10] sm:$0xff] }
 0x26b   : > { %5295 = vmatprep.subr.bf16.mxu1 %v5396_v41  ;;  %v6307_v41 = vld [vmem:[%s6415_s8 + $0x8] sm:$0xff] }
 0x26e   : > { %5297 = vmatpush3.bf16.msra.mxu1 %v5296_v52 }
 0x26f   : > { %5189 = vmatprep.subr.msk.mxu1 %vm3841_vm7, %v3811_v60 }
 0x33c   : > { %v3721_v29 = vpop.f32.mrb[64].mxu1 }
 0x33d   : > { %v3722_v30 = vadd.f32 %v4659_v12, %v3721_v29  ;;  %v5177_v47 = vpop.f32.mrb[65].mxu1 }
 0x33f   : > { %5187 = vmatmul.mubr.msk.f32.vlgmr.msra.gmra.mrb[66].mxu1 %vm3729_vm8, %v3722_v30 }
 0x340   : > { %5190 = vmatpush3.msk.msra.mxu1 %vm3841_vm7, %v3811_v60  ;;  %5191 = vmatprep.mubr.msk.f32.mxu1 %vm3816_vm9, %v6300_v15 }
 0x341   : > { %5299 = vmatprep.subr.bf16.mxu1 %v5298_v25 }
 0x343   : > { %5192 = vmatmul.mubr.msk.f32.vlgmr.msra.gmra.mrb[68].mxu1 %vm3816_vm9, %v6307_v41 }
 0x344   : > { %5194 = vmatprep.mubr.msk.f32.mxu1 %vm3816_vm9, %v6312_v62  ;;  %5301 = vmatpush3.bf16.msra.mxu1 %v5298_v25 }
 0x347   : > { %5195 = vmatmul.mubr.msk.f32.gmra.mrb[70].mxu1 %vm3816_vm9, %v6321_v23 }
 0x348   : > { %5197 = vmatprep.mubr.msk.f32.mxu1 %vm3816_vm9, %v6326_v6 }
 0x34b   : > { %5198 = vmatmul.mubr.msk.f32.gmra.mrb[72].mxu1 %vm3816_vm9, %v6335_v42 }
 0x34c   : > { %5200 = vmatprep.mubr.msk.f32.mxu1 %vm3816_vm9, %v6340_v28 }
 0x34f   : > { %5201 = vmatmul.mubr.msk.f32.gmra.mrb[74].mxu1 %vm3816_vm9, %v6349_v59 }
 0x412   : > { %v3799_v2 = vpop.f32.mrb[66].mxu1 }
 0x413   : > { %v5188_v9 = vpop.f32.mrb[67].mxu1  ;;  %v3815_v33 = vrot.slane %v3799_v2, %v3814_v4 }
 0x416   : > { %v5193_v44 = vpop.f32.mrb[68].mxu1 }
 0x417   : > { %v3917_v13 = vadd.f32 %v5193_v44, %v3815_v33  ;;  %v3911_v34 = vpop.f32.mrb[69].mxu1 }
 0x418   : > { %v3912_v3 = vadd.f32 %v3911_v34, %v3815_v33 }
 0x419   : > { %v3958_v14 = vadd.f32 %v4671_v40, %v3917_v13 }
 0x41a   : > { %v3957_v1 = vadd.f32 %v4671_v40, %v3912_v3  ;;  %v5196_v45 = vpop.f32.mrb[70].mxu1 }
 0x41b   : > { %v3974_v35 = vmul.f32 0.02, %v3958_v14  ;;  %v3927_v21 = vadd.f32 %v5196_v45, %v3815_v33  ;;  %v3921_v17 = vpop.f32.mrb[71].mxu1  ;;  %vm3966_vm10 = vcmp.gt.f32.partialorder %v3958_v14, 0.0 }
 0x41c   : > { %v3973_v8 = vmul.f32 0.02, %v3957_v1  ;;  %v3922_v16 = vadd.f32 %v3921_v17, %v3815_v33  ;;  %vm3965_vm11 = vcmp.gt.f32.partialorder %v3957_v1, 0.0 }
 0x41d   : > { %v3960_v20 = vadd.f32 %v4671_v40, %v3927_v21  ;;  %v3982_v22 = vsel %vm3966_vm10, %v3958_v14, %v3974_v35 }
 0x41e   : > { %v3959_v46 = vadd.f32 %v4671_v40, %v3922_v16  ;;  %v5199_v11 = vpop.f32.mrb[72].mxu1  ;;  %v3981_v49 = vsel %vm3965_vm11, %v3957_v1, %v3973_v8 }
 0x41f   : > { %v3976_v10 = vmul.f32 0.02, %v3960_v20  ;;  %v3937_v50 = vadd.f32 %v5199_v11, %v3815_v33  ;;  %v3931_v19 = vpop.f32.mrb[73].mxu1  ;;  %5207 = vmatprep.mubr.msk.f32.mxu1 %vm3619_vm6, %v3981_v49  ;;  %vm3968_vm13 = vcmp.gt.f32.partialorder %v3960_v20, 0.0 }
 0x420   : > { %v3975_v36 = vmul.f32 0.02, %v3959_v46  ;;  %v3932_v24 = vadd.f32 %v3931_v19, %v3815_v33  ;;  %5208 = vmatmul.mubr.msk.f32.vlgmr.msra.gmra.mrb[76].mxu1 %vm3619_vm6, %v3982_v22  ;;  %vm3967_vm12 = vcmp.gt.f32.partialorder %v3959_v46, 0.0 }
 0x421   : > { %v3962_v57 = vadd.f32 %v4671_v40, %v3937_v50  ;;  %v3984_v38 = vsel %vm3968_vm13, %v3960_v20, %v3976_v10  ;;  %v4681_v10 = vld [vmem:[%s6422_s15] ss:$0 sm:$0xff] }
 0x422   : > { %v3961_v56 = vadd.f32 %v4671_v40, %v3932_v24  ;;  %v5202_v37 = vpop.f32.mrb[74].mxu1  ;;  %v3983_v54 = vsel %vm3967_vm12, %v3959_v46, %v3975_v36 }
 0x423   : > { %v3978_v26 = vmul.f32 0.02, %v3962_v57  ;;  %v3947_v5 = vadd.f32 %v5202_v37, %v3815_v33  ;;  %v3941_v0 = vpop.f32.mrb[75].mxu1  ;;  %5210 = vmatprep.mubr.msk.f32.mxu1 %vm3619_vm6, %v3983_v54  ;;  %vm3970_vm15 = vcmp.gt.f32.partialorder %v3962_v57, 0.0 }
 0x424   : > { %v3977_v51 = vmul.f32 0.02, %v3961_v56  ;;  %v3942_v27 = vadd.f32 %v3941_v0, %v3815_v33  ;;  %5211 = vmatmul.mubr.msk.f32.gmra.mrb[78].mxu1 %vm3619_vm6, %v3984_v38  ;;  %vm3969_vm14 = vcmp.gt.f32.partialorder %v3961_v56, 0.0 }
 0x425   : > { %v3964_v7 = vadd.f32 %v4671_v40, %v3947_v5  ;;  %v3986_v18 = vsel %vm3970_vm15, %v3962_v57, %v3978_v26 }
 0x426   : > { %v3963_v58 = vadd.f32 %v4671_v40, %v3942_v27  ;;  %v3985_v55 = vsel %vm3969_vm14, %v3961_v56, %v3977_v51 }
 0x427   : > { %v3980_v39 = vmul.f32 0.02, %v3964_v7  ;;  %5213 = vmatprep.mubr.msk.f32.mxu1 %vm3619_vm6, %v3985_v55  ;;  %vm3972_vm1 = vcmp.gt.f32.partialorder %v3964_v7, 0.0 }
 0x428   : > { %v3979_v52 = vmul.f32 0.02, %v3963_v58  ;;  %5214 = vmatmul.mubr.msk.f32.gmra.mrb[80].mxu1 %vm3619_vm6, %v3986_v18  ;;  %vm3971_vm0 = vcmp.gt.f32.partialorder %v3963_v58, 0.0 }
 0x429   : > { %v3988_v12 = vsel %vm3972_vm1, %v3964_v7, %v3980_v39 }
 0x42a   : > { %v3987_v60 = vsel %vm3971_vm0, %v3963_v58, %v3979_v52 }
 0x42b   : > { %5216 = vmatprep.mubr.msk.f32.mxu1 %vm3619_vm6, %v3987_v60 }
 0x42c   : > { %5217 = vmatmul.mubr.msk.f32.gmra.mrb[82].mxu1 %vm3619_vm6, %v3988_v12 }
 0x4f3   : > { %v5209_v48 = vpop.f32.mrb[76].mxu1 }
 0x4f4   : > { %v4094_v29 = vadd.f32 %v5209_v48, %v4672_v61  ;;  %v4088_v30 = vpop.f32.mrb[77].mxu1 }
 0x4f5   : > { %v4089_v47 = vadd.f32 %v4672_v61, %v4088_v30 }
 0x4f6   : > { %v4136_v25 = vmul.f32 0.02, %v4094_v29  ;;  %vm4128_vm2 = vcmp.gt.f32.partialorder %v4094_v29, 0.0 }
 0x4f7   : > { %vm4127_vm3 = vcmp.gt.f32.partialorder %v4089_v47, 0.0  ;;  %v4135_v31 = vmul.f32 0.02, %v4089_v47  ;;  %v5212_v43 = vpop.f32.mrb[78].mxu1 }
 0x4f8   : > { %v4104_v53 = vadd.f32 %v5212_v43, %v4672_v61  ;;  %v4098_v32 = vpop.f32.mrb[79].mxu1  ;;  %v4144_v2 = vsel %vm4128_vm2, %v4094_v29, %v4136_v25 }
 0x4f9   : > { %v4099_v63 = vadd.f32 %v4672_v61, %v4098_v32  ;;  %v4143_v4 = vsel %vm4127_vm3, %v4089_v47, %v4135_v31 }
 0x4fa   : > { %v4138_v9 = vmul.f32 0.02, %v4104_v53  ;;  %5223 = vmatprep.mubr.msk.f32.mxu0 %vm3619_vm6, %v4143_v4  ;;  %vm4130_vm4 = vcmp.gt.f32.partialorder %v4104_v53, 0.0 }
 0x4fb   : > { %vm4129_vm5 = vcmp.gt.f32.partialorder %v4099_v63, 0.0  ;;  %v4137_v33 = vmul.f32 0.02, %v4099_v63  ;;  %v5215_v44 = vpop.f32.mrb[80].mxu1  ;;  %5224 = vmatmul.mubr.msk.f32.vlgmr.msra.gmra.mrb[16].mxu0 %vm3619_vm6, %v4144_v2 }
 0x4fc   : > { %v4114_v40 = vadd.f32 %v5215_v44, %v4672_v61  ;;  %v4108_v13 = vpop.f32.mrb[81].mxu1  ;;  %v4146_v1 = vsel %vm4130_vm4, %v4104_v53, %v4138_v9 }
 0x4fd   : > { %v4109_v34 = vadd.f32 %v4672_v61, %v4108_v13  ;;  %v4145_v3 = vsel %vm4129_vm5, %v4099_v63, %v4137_v33 }
 0x4fe   : > { %v4140_v14 = vmul.f32 0.02, %v4114_v40  ;;  %5226 = vmatprep.mubr.msk.f32.mxu0 %vm3619_vm6, %v4145_v3  ;;  %vm4132_vm7 = vcmp.gt.f32.partialorder %v4114_v40, 0.0 }
 0x4ff   : > { %vm4131_vm8 = vcmp.gt.f32.partialorder %v4109_v34, 0.0  ;;  %v4139_v45 = vmul.f32 0.02, %v4109_v34  ;;  %v5218_v35 = vpop.f32.mrb[82].mxu1  ;;  %5227 = vmatmul.mubr.msk.f32.gmra.mrb[18].mxu0 %vm3619_vm6, %v4146_v1 }
 0x500   : > { %v4124_v21 = vadd.f32 %v5218_v35, %v4672_v61  ;;  %v4118_v17 = vpop.f32.mrb[83].mxu1  ;;  %v4148_v46 = vsel %vm4132_vm7, %v4114_v40, %v4140_v14 }
 0x501   : > { %v4119_v8 = vadd.f32 %v4672_v61, %v4118_v17  ;;  %v4147_v16 = vsel %vm4131_vm8, %v4109_v34, %v4139_v45 }
 0x502   : > { %v4142_v20 = vmul.f32 0.02, %v4124_v21  ;;  %5229 = vmatprep.mubr.msk.f32.mxu0 %vm3619_vm6, %v4147_v16  ;;  %vm4134_vm10 = vcmp.gt.f32.partialorder %v4124_v21, 0.0 }
 0x503   : > { %vm4133_vm11 = vcmp.gt.f32.partialorder %v4119_v8, 0.0  ;;  %v4141_v11 = vmul.f32 0.02, %v4119_v8  ;;  %5230 = vmatmul.mubr.msk.f32.gmra.mrb[20].mxu0 %vm3619_vm6, %v4148_v46 }
 0x504   : > { %v4150_v22 = vsel %vm4134_vm10, %v4124_v21, %v4142_v20 }
 0x505   : > { %v4149_v49 = vsel %vm4133_vm11, %v4119_v8, %v4141_v11 }
 0x506   : > { %5232 = vmatprep.mubr.msk.f32.mxu0 %vm3619_vm6, %v4149_v49 }
 0x507   : > { %5233 = vmatmul.mubr.msk.f32.gmra.mrb[22].mxu0 %vm3619_vm6, %v4150_v22 }
 0x5ce   : > { %v5225_v50 = vpop.f32.mrb[16].mxu0 }
 0x5cf   : > { %v4256_v19 = vadd.f32 %v5225_v50, %v4681_v10  ;;  %v4250_v36 = vpop.f32.mrb[17].mxu0 }
 0x5d0   : > { %v4251_v24 = vadd.f32 %v4681_v10, %v4250_v36 }
 0x5d1   : > { %v4290_v57 = vadd.f32 %v4256_v19, %v6307_v41 }
 0x5d2   : > { %v4289_v56 = vadd.f32 %v4251_v24, %v6300_v15  ;;  %v5228_v37 = vpop.f32.mrb[18].mxu0 }
 0x5d3   : > { %4298 = vst.msk [vmem:[%s521_s23 + $0x8] sm:$0xff] %vm3816_vm9, %v4290_v57  ;;  %v4266_v54 = vadd.f32 %v5228_v37, %v4681_v10  ;;  %v4260_v26 = vpop.f32.mrb[19].mxu0 }
 0x5d4   : > { %4297 = vst.msk [vmem:[%s521_s23] sm:$0xff] %vm3816_vm9, %v4289_v56  ;;  %v4261_v5 = vadd.f32 %v4681_v10, %v4260_v26 }
 0x5d5   : > { %v4292_v0 = vadd.f32 %v4266_v54, %v6321_v23 }
 0x5d6   : > { %v4291_v38 = vadd.f32 %v4261_v5, %v6312_v62  ;;  %v5231_v51 = vpop.f32.mrb[20].mxu0 }
 0x5d7   : > { %4300 = vst.msk [vmem:[%s521_s23 + $0x18] sm:$0xff] %vm3816_vm9, %v4292_v0  ;;  %v4276_v27 = vadd.f32 %v5231_v51, %v4681_v10  ;;  %v4270_v7 = vpop.f32.mrb[21].mxu0 }
 0x5d8   : > { %4299 = vst.msk [vmem:[%s521_s23 + $0x10] sm:$0xff] %vm3816_vm9, %v4291_v38  ;;  %v4271_v15 = vadd.f32 %v4681_v10, %v4270_v7 }
 0x5d9   : > { %v4294_v41 = vadd.f32 %v4276_v27, %v6335_v42 }
 0x5da   : > { %v4293_v58 = vadd.f32 %v4271_v15, %v6326_v6  ;;  %v5234_v55 = vpop.f32.mrb[22].mxu0 }
 0x5db   : > { %4302 = vst.msk [vmem:[%s521_s23 + $0x28] sm:$0xff] %vm3816_vm9, %v4294_v41  ;;  %v4286_v39 = vadd.f32 %v5234_v55, %v4681_v10  ;;  %v4280_v18 = vpop.f32.mrb[23].mxu0 }
 0x5dc   : > { %4301 = vst.msk [vmem:[%s521_s23 + $0x20] sm:$0xff] %vm3816_vm9, %v4293_v58  ;;  %v4281_v62 = vadd.f32 %v4681_v10, %v4280_v18 }
 0x5dd   : > { %v4296_v23 = vadd.f32 %v4286_v39, %v6349_v59 }
 0x5de   : > { %v4295_v52 = vadd.f32 %v4281_v62, %v6340_v28 }
 0x5df   : > { %4304 = vst.msk [vmem:[%s521_s23 + $0x38] sm:$0xff] %vm3816_vm9, %v4296_v23 }
 0x5e0   : > { %4303 = vst.msk [vmem:[%s521_s23 + $0x30] sm:$0xff] %vm3816_vm9, %v4295_v52 }
 0x5e1 PF: > { %s26_s21 = sadd.s32 1, %s5392_s21  }
 0x5e2   : > { %p23_p4 = scmp.ge.s32.totalorder %s26_s21, 4  }
 0x5e4   :  { %25 = sbr.rel (!%p23_p4) target bundleno = 2 (0x2), region = 138 }

</bundles_post_ra>
